<compile_context>
chip_gen: v5e
topology: v5e:2x2
jax: 0.10.0
libtpu: 0.0.40
codegen_flags: <defaults>
</compile_context>

<pallas_src>
import numpy as np
import jax
import jax.numpy as jnp
from jax.experimental import pallas as pl
from jax.experimental.pallas import tpu as pltpu


def make_rqnn_kernel(*, hidden_num, lstm_layers, B_tile, T, S, H, L, A, atomn,
                     OUT_PAD, state_min, state_max, normalize, distributional):
    rows = B_tile * T

    def kernel(*refs):
        idx = 0
        lens_ref = refs[idx]; idx += 1              # (B_tile, 1) int32  VMEM
        x_ref = refs[idx]; idx += 1                 # (T, B_tile, S)     VMEM
        mlp_w, mlp_b = [], []
        for _ in range(hidden_num):
            mlp_w.append(refs[idx]); idx += 1
            mlp_b.append(refs[idx]); idx += 1
        wih, whh, bih, bhh = [], [], [], []
        for _ in range(lstm_layers):
            wih.append(refs[idx]); idx += 1
            whh.append(refs[idx]); idx += 1
            bih.append(refs[idx]); idx += 1
            bhh.append(refs[idx]); idx += 1
        whead_ref = refs[idx]; idx += 1             # (L, OUT_PAD)
        bhead_ref = refs[idx]; idx += 1             # (1, OUT_PAD)
        seg_ref = refs[idx]; idx += 1               # (OUT_PAD, OUT_PAD) block-diag const
        out_ref = refs[idx]; idx += 1               # (T, B_tile, OUT_PAD)
        h_out_ref = refs[idx]; idx += 1             # (lstm_layers, B_tile, L)
        c_out_ref = refs[idx]; idx += 1             # (lstm_layers, B_tile, L)

        lens = lens_ref[...]                        # (B_tile, 1)

        # ------------- MLP over all rows of the tile at once (time-major) ----
        h = x_ref[...].reshape(rows, S)
        if normalize:
            h = (h - state_min) * (1.0 / (state_max - state_min))
        for li in range(hidden_num):
            h = jnp.dot(h, mlp_w[li][...],
                        preferred_element_type=jnp.float32) + mlp_b[li][...]
            h = jnp.maximum(h, 0.0)
        cur = h                                     # (rows, H)

        # ------------- LSTM: batched over B_tile, x-projection hoisted -------
        for layer in range(lstm_layers):
            bias = bih[layer][...] + bhh[layer][...]                 # (1, 4L)
            gx = jnp.dot(cur, wih[layer][...],
                         preferred_element_type=jnp.float32) + bias  # (rows, 4L)
            w_h = whh[layer][...]                                    # (L, 4L)
            h_st = jnp.zeros((B_tile, L), jnp.float32)
            c_st = jnp.zeros((B_tile, L), jnp.float32)
            outs = []
            for t in range(T):                      # T is static -> fully unrolled
                # gates: hoisted x-projection slice (tile-aligned 8-row block)
                # plus the only serial dependency, h @ W_hh
                g = gx[t * B_tile:(t + 1) * B_tile, :] + jnp.dot(
                    h_st, w_h, preferred_element_type=jnp.float32)   # (B_tile, 4L)
                i_g = jax.nn.sigmoid(g[:, 0 * L:1 * L])              # PyTorch order i,f,g,o
                f_g = jax.nn.sigmoid(g[:, 1 * L:2 * L])
                g_g = jnp.tanh(g[:, 2 * L:3 * L])
                o_g = jax.nn.sigmoid(g[:, 3 * L:4 * L])
                c_new = f_g * c_st + i_g * g_g
                h_new = o_g * jnp.tanh(c_new)
                valid = lens > t                    # (B_tile,1) packed-sequence mask
                h_st = jnp.where(valid, h_new, h_st)
                c_st = jnp.where(valid, c_new, c_st)
                outs.append(jnp.where(valid, h_new, jnp.zeros_like(h_new)))
            h_out_ref[layer] = h_st                 # one dense (B_tile, L) store
            c_out_ref[layer] = c_st
            cur = jnp.concatenate(outs, axis=0)     # (rows, L), time-major

        # ------------- head + fused per-action softmax ------------------------
        logits = jnp.dot(cur, whead_ref[...],
                         preferred_element_type=jnp.float32) + bhead_ref[...]  # (rows, OUT_PAD)
        if distributional:
            # global row max: numerically equivalent to per-segment max (it cancels)
            m = jnp.max(logits, axis=-1, keepdims=True)
            e = jnp.exp(logits - m)
            seg_sums = jnp.dot(e, seg_ref[...],
                               preferred_element_type=jnp.float32)   # segmented sums (MXU)
            probs = e * pl.reciprocal(seg_sums, approx=True)
            out_ref[...] = probs.reshape(T, B_tile, OUT_PAD)
        else:
            out_ref[...] = logits.reshape(T, B_tile, OUT_PAD)

    return kernel


def init_params(key, cfg):
    S, H, L, A, atomn = cfg["S"], cfg["H"], cfg["L"], cfg["A"], cfg["atomn"]
    hidden_num, lstm_layers = cfg["hidden_num"], cfg["lstm_layers"]
    keys = iter(jax.random.split(key, 2 * hidden_num + 4 * lstm_layers + 2))

    def uni(shape, fan_in):
        k = 1.0 / np.sqrt(fan_in)
        return jax.random.uniform(next(keys), shape, jnp.float32, -k, k)

    mlp = []
    in_dim = S
    for _ in range(hidden_num):
        mlp.append((uni((in_dim, H), in_dim), uni((1, H), in_dim)))
        in_dim = H
    lstm = []
    in_dim = H
    for _ in range(lstm_layers):
        lstm.append((uni((in_dim, 4 * L), L), uni((L, 4 * L), L),
                     uni((1, 4 * L), L), uni((1, 4 * L), L)))
        in_dim = L
    head = (uni((L, A * atomn), L), uni((1, A * atomn), L))
    return mlp, lstm, head


def build_forward(cfg):
    B, T, S, H, L = cfg["B"], cfg["T"], cfg["S"], cfg["H"], cfg["L"]
    A, atomn = cfg["A"], cfg["atomn"]
    hidden_num, lstm_layers = cfg["hidden_num"], cfg["lstm_layers"]
    distributional = cfg["distributional"]
    B_tile = cfg["B_tile"]
    assert B % B_tile == 0 and B_tile % 8 == 0, "B_tile must be a multiple of 8 dividing B"

    OUT = A * atomn
    OUT_PAD = ((OUT + 127) // 128) * 128            # lane-dense output (>=128)

    kernel = make_rqnn_kernel(
        hidden_num=hidden_num, lstm_layers=lstm_layers, B_tile=B_tile, T=T, S=S,
        H=H, L=L, A=A, atomn=atomn, OUT_PAD=OUT_PAD,
        state_min=cfg["state_min"], state_max=cfg["state_max"],
        normalize=cfg["normalize"], distributional=distributional)

    # constant block-diagonal segment-sum matrix (identity on the padded tail
    # so the padded lanes don't divide by zero; wrapper slices them off anyway)
    seg_np = np.zeros((OUT_PAD, OUT_PAD), np.float32)
    for a in range(A):
        seg_np[a * atomn:(a + 1) * atomn, a * atomn:(a + 1) * atomn] = 1.0
    for k in range(OUT, OUT_PAD):
        seg_np[k, k] = 1.0
    seg_const = jnp.asarray(seg_np)

    # -------- specs: batch-tiled activations, full-resident weights ----------
    param_shapes = []
    in_dim = S
    for _ in range(hidden_num):
        param_shapes += [(in_dim, H), (1, H)]
        in_dim = H
    in_dim = H
    for _ in range(lstm_layers):
        param_shapes += [(in_dim, 4 * L), (L, 4 * L), (1, 4 * L), (1, 4 * L)]
        in_dim = L
    param_shapes += [(L, OUT_PAD), (1, OUT_PAD), (OUT_PAD, OUT_PAD)]

    in_specs = [
        pl.BlockSpec((B_tile, 1), lambda i: (i, 0)),            # lengths
        pl.BlockSpec((T, B_tile, S), lambda i: (0, i, 0)),      # x (time-major)
    ]
    for shp in param_shapes:                                    # all 2-D, constant block
        in_specs.append(pl.BlockSpec(shp, lambda i: (0, 0)))

    out_shape = (
        jax.ShapeDtypeStruct((T, B, OUT_PAD), jnp.float32),
        jax.ShapeDtypeStruct((lstm_layers, B, L), jnp.float32),
        jax.ShapeDtypeStruct((lstm_layers, B, L), jnp.float32),
    )
    out_specs = (
        pl.BlockSpec((T, B_tile, OUT_PAD), lambda i: (0, i, 0)),
        pl.BlockSpec((lstm_layers, B_tile, L), lambda i: (0, i, 0)),
        pl.BlockSpec((lstm_layers, B_tile, L), lambda i: (0, i, 0)),
    )

    call = pl.pallas_call(
        kernel,
        out_shape=out_shape,
        grid=(B // B_tile,),
        in_specs=in_specs,
        out_specs=out_specs,
        compiler_params=pltpu.CompilerParams(
            dimension_semantics=("parallel",),      # shard batch tiles across TCs (v7x)
            vmem_limit_bytes=16 * 1024 * 1024),
    )

    def forward(x, lengths, params):
        mlp, lstm, head = params
        w_head, b_head = head
        w_head_pad = jnp.zeros((L, OUT_PAD), jnp.float32).at[:, :OUT].set(w_head)
        b_head_pad = jnp.zeros((1, OUT_PAD), jnp.float32).at[:, :OUT].set(b_head)
        flat = []
        for w, b in mlp:
            flat += [w, b]
        for wi, wh, bi, bh in lstm:
            flat += [wi, wh, bi, bh]
        flat += [w_head_pad, b_head_pad, seg_const]

        x_tm = jnp.transpose(x, (1, 0, 2))                      # (T, B, S) time-major
        lens2d = lengths.reshape(B, 1).astype(jnp.int32)
        y_pad, h_n, c_n = call(lens2d, x_tm, *flat)
        y = jnp.transpose(y_pad, (1, 0, 2))[..., :OUT]          # (B, T, A*atomn)
        if distributional:
            y = y.reshape(B * T, A, atomn)                      # matches logits.view(-1, A, atomn)
        return y, (h_n, c_n)

    return jax.jit(forward)


def ref_forward(x, lengths, params, cfg):
    """Pure-numpy reference of the same forward pass."""
    B, T, S, H, L = cfg["B"], cfg["T"], cfg["S"], cfg["H"], cfg["L"]
    A, atomn = cfg["A"], cfg["atomn"]
    mlp, lstm, head = params

    def sigmoid(v):
        return 1.0 / (1.0 + np.exp(-v))

    h = x.astype(np.float32)
    if cfg["normalize"]:
        h = (h - cfg["state_min"]) / (cfg["state_max"] - cfg["state_min"])
    h = h.reshape(B * T, S)
    for w, b in mlp:
        h = np.maximum(h @ w + b, 0.0)
    inp = h.reshape(B, T, H)

    h_n = np.zeros((cfg["lstm_layers"], B, L), np.float32)
    c_n = np.zeros((cfg["lstm_layers"], B, L), np.float32)
    for layer, (wi, wh, bi, bh) in enumerate(lstm):
        out = np.zeros((B, T, L), np.float32)
        for b in range(B):
            hh = np.zeros((L,), np.float32)
            cc = np.zeros((L,), np.float32)
            for t in range(int(lengths[b])):
                g = inp[b, t] @ wi + hh @ wh + bi[0] + bh[0]
                i_g = sigmoid(g[0 * L:1 * L])
                f_g = sigmoid(g[1 * L:2 * L])
                g_g = np.tanh(g[2 * L:3 * L])
                o_g = sigmoid(g[3 * L:4 * L])
                cc = f_g * cc + i_g * g_g
                hh = o_g * np.tanh(cc)
                out[b, t] = hh
            h_n[layer, b] = hh
            c_n[layer, b] = cc
        inp = out

    logits = inp.reshape(B * T, L) @ head[0] + head[1]
    logits = logits.reshape(B * T, A, atomn)
    m = logits.max(-1, keepdims=True)
    e = np.exp(logits - m)
    probs = e / e.sum(-1, keepdims=True)
    return probs, h_n, c_n


if __name__ == "__main__":
    cfg = dict(B=16, T=8, S=8, H=32, L=32, A=3, atomn=5,
               hidden_num=2, lstm_layers=1, B_tile=8,
               state_min=0.0, state_max=10.0,
               normalize=True, distributional=True)

    key = jax.random.PRNGKey(0)
    kx, kp = jax.random.split(key)
    x = jax.random.uniform(kx, (cfg["B"], cfg["T"], cfg["S"]), jnp.float32,
                           cfg["state_min"], cfg["state_max"])
    # ragged batch (pack_padded_sequence semantics), lengths in [1, T]
    lengths = jnp.array([8, 5, 8, 3, 7, 8, 2, 6, 8, 4, 8, 1, 5, 8, 8, 3],
                        dtype=jnp.int32)
    params = init_params(kp, cfg)

    fwd = build_forward(cfg)
    probs, (h_n, c_n) = fwd(x, lengths, params)
    jax.block_until_ready((probs, h_n, c_n))

    probs_ref, h_ref, c_ref = ref_forward(
        np.asarray(x), np.asarray(lengths),
        jax.tree_util.tree_map(np.asarray, params), cfg)
    np.testing.assert_allclose(np.asarray(probs), probs_ref, rtol=1e-2, atol=1e-2)
    np.testing.assert_allclose(np.asarray(h_n), h_ref, rtol=1e-2, atol=1e-2)
    np.testing.assert_allclose(np.asarray(c_n), c_ref, rtol=1e-2, atol=1e-2)

    print("KERNEL_OK")
</pallas_src>

<mosaic_0001>
module attributes {stable_mosaic.version = 11 : i64} {
  func.func @kernel(%arg0: i32, %arg1: memref<8x1xi32, #tpu.memory_space<vmem>>, %arg2: memref<8x8x8xf32, #tpu.memory_space<vmem>>, %arg3: memref<8x32xf32, #tpu.memory_space<vmem>>, %arg4: memref<1x32xf32, #tpu.memory_space<vmem>>, %arg5: memref<32x32xf32, #tpu.memory_space<vmem>>, %arg6: memref<1x32xf32, #tpu.memory_space<vmem>>, %arg7: memref<32x128xf32, #tpu.memory_space<vmem>>, %arg8: memref<32x128xf32, #tpu.memory_space<vmem>>, %arg9: memref<1x128xf32, #tpu.memory_space<vmem>>, %arg10: memref<1x128xf32, #tpu.memory_space<vmem>>, %arg11: memref<32x128xf32, #tpu.memory_space<vmem>>, %arg12: memref<1x128xf32, #tpu.memory_space<vmem>>, %arg13: memref<128x128xf32, #tpu.memory_space<vmem>>, %arg14: memref<8x8x128xf32, #tpu.memory_space<vmem>>, %arg15: memref<1x8x32xf32, #tpu.memory_space<vmem>>, %arg16: memref<1x8x32xf32, #tpu.memory_space<vmem>>) attributes {dimension_semantics = [#tpu.dimension_semantics<parallel>], iteration_bounds = array<i64: 2>, scalar_prefetch = 0 : i64, scratch_operands = 0 : i64, tpu.core_type = #tpu.core_type<tc>, window_params = [{transform_indices = @transform_0, window_bounds = array<i64: 8, 1>}, {transform_indices = @transform_1, window_bounds = array<i64: 8, 8, 8>}, {pipeline_mode = #tpu.pipeline_mode<synchronous>, transform_indices = @transform_2, window_bounds = array<i64: 8, 32>}, {pipeline_mode = #tpu.pipeline_mode<synchronous>, transform_indices = @transform_3, window_bounds = array<i64: 1, 32>}, {pipeline_mode = #tpu.pipeline_mode<synchronous>, transform_indices = @transform_4, window_bounds = array<i64: 32, 32>}, {pipeline_mode = #tpu.pipeline_mode<synchronous>, transform_indices = @transform_5, window_bounds = array<i64: 1, 32>}, {pipeline_mode = #tpu.pipeline_mode<synchronous>, transform_indices = @transform_6, window_bounds = array<i64: 32, 128>}, {pipeline_mode = #tpu.pipeline_mode<synchronous>, transform_indices = @transform_7, window_bounds = array<i64: 32, 128>}, {pipeline_mode = #tpu.pipeline_mode<synchronous>, transform_indices = @transform_8, window_bounds = array<i64: 1, 128>}, {pipeline_mode = #tpu.pipeline_mode<synchronous>, transform_indices = @transform_9, window_bounds = array<i64: 1, 128>}, {pipeline_mode = #tpu.pipeline_mode<synchronous>, transform_indices = @transform_10, window_bounds = array<i64: 32, 128>}, {pipeline_mode = #tpu.pipeline_mode<synchronous>, transform_indices = @transform_11, window_bounds = array<i64: 1, 128>}, {pipeline_mode = #tpu.pipeline_mode<synchronous>, transform_indices = @transform_12, window_bounds = array<i64: 128, 128>}, {transform_indices = @transform_13, window_bounds = array<i64: 8, 8, 128>}, {transform_indices = @transform_14, window_bounds = array<i64: 1, 8, 32>}, {transform_indices = @transform_15, window_bounds = array<i64: 1, 8, 32>}]} {
    %c0 = arith.constant 0 : index
    %c0_0 = arith.constant 0 : index
    %0 = vector.load %arg1[%c0, %c0_0] : memref<8x1xi32, #tpu.memory_space<vmem>>, vector<8x1xi32>
    %c0_1 = arith.constant 0 : index
    %c0_2 = arith.constant 0 : index
    %c0_3 = arith.constant 0 : index
    %1 = vector.load %arg2[%c0_1, %c0_2, %c0_3] : memref<8x8x8xf32, #tpu.memory_space<vmem>>, vector<8x8x8xf32>
    %2 = vector.shape_cast %1 : vector<8x8x8xf32> to vector<64x8xf32>
    %cst = arith.constant 0.000000e+00 : f32
    %3 = vector.broadcast %cst : f32 to vector<64x8xf32>
    %4 = arith.subf %2, %3 : vector<64x8xf32>
    %cst_4 = arith.constant 1.000000e-01 : f32
    %5 = vector.broadcast %cst_4 : f32 to vector<64x8xf32>
    %6 = arith.mulf %4, %5 : vector<64x8xf32>
    %c0_5 = arith.constant 0 : index
    %c0_6 = arith.constant 0 : index
    %7 = vector.load %arg3[%c0_5, %c0_6] : memref<8x32xf32, #tpu.memory_space<vmem>>, vector<8x32xf32>
    %cst_7 = arith.constant dense<0.000000e+00> : vector<64x32xf32>
    %8 = tpu.matmul %6, %7, %cst_7 {dimension_numbers = #tpu.dot_dimension_numbers<[1], [0], [0], [1], [0, 0, 1, 1], [], []>} : vector<64x8xf32>, vector<8x32xf32>, vector<64x32xf32> -> vector<64x32xf32>
    %c0_8 = arith.constant 0 : index
    %c0_9 = arith.constant 0 : index
    %9 = vector.load %arg4[%c0_8, %c0_9] : memref<1x32xf32, #tpu.memory_space<vmem>>, vector<1x32xf32>
    %10 = vector.broadcast %9 : vector<1x32xf32> to vector<64x32xf32>
    %11 = arith.addf %8, %10 : vector<64x32xf32>
    %cst_10 = arith.constant 0.000000e+00 : f32
    %12 = vector.broadcast %cst_10 : f32 to vector<64x32xf32>
    %13 = arith.maximumf %11, %12 : vector<64x32xf32>
    %c0_11 = arith.constant 0 : index
    %c0_12 = arith.constant 0 : index
    %14 = vector.load %arg5[%c0_11, %c0_12] : memref<32x32xf32, #tpu.memory_space<vmem>>, vector<32x32xf32>
    %cst_13 = arith.constant dense<0.000000e+00> : vector<64x32xf32>
    %15 = tpu.matmul %13, %14, %cst_13 {dimension_numbers = #tpu.dot_dimension_numbers<[1], [0], [0], [1], [0, 0, 1, 1], [], []>} : vector<64x32xf32>, vector<32x32xf32>, vector<64x32xf32> -> vector<64x32xf32>
    %c0_14 = arith.constant 0 : index
    %c0_15 = arith.constant 0 : index
    %16 = vector.load %arg6[%c0_14, %c0_15] : memref<1x32xf32, #tpu.memory_space<vmem>>, vector<1x32xf32>
    %17 = vector.broadcast %16 : vector<1x32xf32> to vector<64x32xf32>
    %18 = arith.addf %15, %17 : vector<64x32xf32>
    %cst_16 = arith.constant 0.000000e+00 : f32
    %19 = vector.broadcast %cst_16 : f32 to vector<64x32xf32>
    %20 = arith.maximumf %18, %19 : vector<64x32xf32>
    %c0_17 = arith.constant 0 : index
    %c0_18 = arith.constant 0 : index
    %21 = vector.load %arg9[%c0_17, %c0_18] : memref<1x128xf32, #tpu.memory_space<vmem>>, vector<1x128xf32>
    %c0_19 = arith.constant 0 : index
    %c0_20 = arith.constant 0 : index
    %22 = vector.load %arg10[%c0_19, %c0_20] : memref<1x128xf32, #tpu.memory_space<vmem>>, vector<1x128xf32>
    %23 = arith.addf %21, %22 : vector<1x128xf32>
    %c0_21 = arith.constant 0 : index
    %c0_22 = arith.constant 0 : index
    %24 = vector.load %arg7[%c0_21, %c0_22] : memref<32x128xf32, #tpu.memory_space<vmem>>, vector<32x128xf32>
    %cst_23 = arith.constant dense<0.000000e+00> : vector<64x128xf32>
    %25 = tpu.matmul %20, %24, %cst_23 {dimension_numbers = #tpu.dot_dimension_numbers<[1], [0], [0], [1], [0, 0, 1, 1], [], []>} : vector<64x32xf32>, vector<32x128xf32>, vector<64x128xf32> -> vector<64x128xf32>
    %26 = vector.broadcast %23 : vector<1x128xf32> to vector<64x128xf32>
    %27 = arith.addf %25, %26 : vector<64x128xf32>
    %c0_24 = arith.constant 0 : index
    %c0_25 = arith.constant 0 : index
    %28 = vector.load %arg8[%c0_24, %c0_25] : memref<32x128xf32, #tpu.memory_space<vmem>>, vector<32x128xf32>
    %cst_26 = arith.constant 0.000000e+00 : f32
    %29 = vector.broadcast %cst_26 : f32 to vector<8x32xf32>
    %cst_27 = arith.constant 0.000000e+00 : f32
    %30 = vector.broadcast %cst_27 : f32 to vector<8x32xf32>
    %31 = vector.extract_strided_slice %27 {offsets = [0, 0], sizes = [8, 128], strides = [1, 1]} : vector<64x128xf32> to vector<8x128xf32>
    %cst_28 = arith.constant dense<0.000000e+00> : vector<8x128xf32>
    %32 = tpu.matmul %29, %28, %cst_28 {dimension_numbers = #tpu.dot_dimension_numbers<[1], [0], [0], [1], [0, 0, 1, 1], [], []>} : vector<8x32xf32>, vector<32x128xf32>, vector<8x128xf32> -> vector<8x128xf32>
    %33 = arith.addf %31, %32 : vector<8x128xf32>
    %34 = vector.extract_strided_slice %33 {offsets = [0, 0], sizes = [8, 32], strides = [1, 1]} : vector<8x128xf32> to vector<8x32xf32>
    %35 = arith.negf %34 : vector<8x32xf32>
    %36 = math.exp %35 : vector<8x32xf32>
    %cst_29 = arith.constant 1.000000e+00 : f32
    %37 = vector.broadcast %cst_29 : f32 to vector<8x32xf32>
    %38 = arith.addf %37, %36 : vector<8x32xf32>
    %39 = arith.divf %37, %38 : vector<8x32xf32>
    %40 = vector.extract_strided_slice %33 {offsets = [0, 32], sizes = [8, 32], strides = [1, 1]} : vector<8x128xf32> to vector<8x32xf32>
    %41 = arith.negf %40 : vector<8x32xf32>
    %42 = math.exp %41 : vector<8x32xf32>
    %cst_30 = arith.constant 1.000000e+00 : f32
    %43 = vector.broadcast %cst_30 : f32 to vector<8x32xf32>
    %44 = arith.addf %43, %42 : vector<8x32xf32>
    %45 = arith.divf %43, %44 : vector<8x32xf32>
    %46 = vector.extract_strided_slice %33 {offsets = [0, 64], sizes = [8, 32], strides = [1, 1]} : vector<8x128xf32> to vector<8x32xf32>
    %47 = math.tanh %46 : vector<8x32xf32>
    %48 = vector.extract_strided_slice %33 {offsets = [0, 96], sizes = [8, 32], strides = [1, 1]} : vector<8x128xf32> to vector<8x32xf32>
    %49 = arith.negf %48 : vector<8x32xf32>
    %50 = math.exp %49 : vector<8x32xf32>
    %cst_31 = arith.constant 1.000000e+00 : f32
    %51 = vector.broadcast %cst_31 : f32 to vector<8x32xf32>
    %52 = arith.addf %51, %50 : vector<8x32xf32>
    %53 = arith.divf %51, %52 : vector<8x32xf32>
    %54 = arith.mulf %45, %30 : vector<8x32xf32>
    %55 = arith.mulf %39, %47 : vector<8x32xf32>
    %56 = arith.addf %54, %55 : vector<8x32xf32>
    %57 = math.tanh %56 : vector<8x32xf32>
    %58 = arith.mulf %53, %57 : vector<8x32xf32>
    %c0_i32 = arith.constant 0 : i32
    %59 = vector.broadcast %c0_i32 : i32 to vector<8x1xi32>
    %60 = arith.cmpi sgt, %0, %59 : vector<8x1xi32>
    %61 = vector.shape_cast %60 : vector<8x1xi1> to vector<8x1xi1>
    %62 = vector.broadcast %61 : vector<8x1xi1> to vector<8x32xi1>
    %63 = arith.select %62, %58, %29 : vector<8x32xi1>, vector<8x32xf32>
    %64 = vector.shape_cast %60 : vector<8x1xi1> to vector<8x1xi1>
    %65 = vector.broadcast %64 : vector<8x1xi1> to vector<8x32xi1>
    %66 = arith.select %65, %56, %30 : vector<8x32xi1>, vector<8x32xf32>
    %cst_32 = arith.constant 0.000000e+00 : f32
    %67 = vector.broadcast %cst_32 : f32 to vector<8x32xf32>
    %68 = vector.shape_cast %60 : vector<8x1xi1> to vector<8x1xi1>
    %69 = vector.broadcast %68 : vector<8x1xi1> to vector<8x32xi1>
    %70 = arith.select %69, %58, %67 : vector<8x32xi1>, vector<8x32xf32>
    %71 = vector.extract_strided_slice %27 {offsets = [8, 0], sizes = [8, 128], strides = [1, 1]} : vector<64x128xf32> to vector<8x128xf32>
    %cst_33 = arith.constant dense<0.000000e+00> : vector<8x128xf32>
    %72 = tpu.matmul %63, %28, %cst_33 {dimension_numbers = #tpu.dot_dimension_numbers<[1], [0], [0], [1], [0, 0, 1, 1], [], []>} : vector<8x32xf32>, vector<32x128xf32>, vector<8x128xf32> -> vector<8x128xf32>
    %73 = arith.addf %71, %72 : vector<8x128xf32>
    %74 = vector.extract_strided_slice %73 {offsets = [0, 0], sizes = [8, 32], strides = [1, 1]} : vector<8x128xf32> to vector<8x32xf32>
    %75 = arith.negf %74 : vector<8x32xf32>
    %76 = math.exp %75 : vector<8x32xf32>
    %cst_34 = arith.constant 1.000000e+00 : f32
    %77 = vector.broadcast %cst_34 : f32 to vector<8x32xf32>
    %78 = arith.addf %77, %76 : vector<8x32xf32>
    %79 = arith.divf %77, %78 : vector<8x32xf32>
    %80 = vector.extract_strided_slice %73 {offsets = [0, 32], sizes = [8, 32], strides = [1, 1]} : vector<8x128xf32> to vector<8x32xf32>
    %81 = arith.negf %80 : vector<8x32xf32>
    %82 = math.exp %81 : vector<8x32xf32>
    %cst_35 = arith.constant 1.000000e+00 : f32
    %83 = vector.broadcast %cst_35 : f32 to vector<8x32xf32>
    %84 = arith.addf %83, %82 : vector<8x32xf32>
    %85 = arith.divf %83, %84 : vector<8x32xf32>
    %86 = vector.extract_strided_slice %73 {offsets = [0, 64], sizes = [8, 32], strides = [1, 1]} : vector<8x128xf32> to vector<8x32xf32>
    %87 = math.tanh %86 : vector<8x32xf32>
    %88 = vector.extract_strided_slice %73 {offsets = [0, 96], sizes = [8, 32], strides = [1, 1]} : vector<8x128xf32> to vector<8x32xf32>
    %89 = arith.negf %88 : vector<8x32xf32>
    %90 = math.exp %89 : vector<8x32xf32>
    %cst_36 = arith.constant 1.000000e+00 : f32
    %91 = vector.broadcast %cst_36 : f32 to vector<8x32xf32>
    %92 = arith.addf %91, %90 : vector<8x32xf32>
    %93 = arith.divf %91, %92 : vector<8x32xf32>
    %94 = arith.mulf %85, %66 : vector<8x32xf32>
    %95 = arith.mulf %79, %87 : vector<8x32xf32>
    %96 = arith.addf %94, %95 : vector<8x32xf32>
    %97 = math.tanh %96 : vector<8x32xf32>
    %98 = arith.mulf %93, %97 : vector<8x32xf32>
    %c1_i32 = arith.constant 1 : i32
    %99 = vector.broadcast %c1_i32 : i32 to vector<8x1xi32>
    %100 = arith.cmpi sgt, %0, %99 : vector<8x1xi32>
    %101 = vector.shape_cast %100 : vector<8x1xi1> to vector<8x1xi1>
    %102 = vector.broadcast %101 : vector<8x1xi1> to vector<8x32xi1>
    %103 = arith.select %102, %98, %63 : vector<8x32xi1>, vector<8x32xf32>
    %104 = vector.shape_cast %100 : vector<8x1xi1> to vector<8x1xi1>
    %105 = vector.broadcast %104 : vector<8x1xi1> to vector<8x32xi1>
    %106 = arith.select %105, %96, %66 : vector<8x32xi1>, vector<8x32xf32>
    %cst_37 = arith.constant 0.000000e+00 : f32
    %107 = vector.broadcast %cst_37 : f32 to vector<8x32xf32>
    %108 = vector.shape_cast %100 : vector<8x1xi1> to vector<8x1xi1>
    %109 = vector.broadcast %108 : vector<8x1xi1> to vector<8x32xi1>
    %110 = arith.select %109, %98, %107 : vector<8x32xi1>, vector<8x32xf32>
    %111 = vector.extract_strided_slice %27 {offsets = [16, 0], sizes = [8, 128], strides = [1, 1]} : vector<64x128xf32> to vector<8x128xf32>
    %cst_38 = arith.constant dense<0.000000e+00> : vector<8x128xf32>
    %112 = tpu.matmul %103, %28, %cst_38 {dimension_numbers = #tpu.dot_dimension_numbers<[1], [0], [0], [1], [0, 0, 1, 1], [], []>} : vector<8x32xf32>, vector<32x128xf32>, vector<8x128xf32> -> vector<8x128xf32>
    %113 = arith.addf %111, %112 : vector<8x128xf32>
    %114 = vector.extract_strided_slice %113 {offsets = [0, 0], sizes = [8, 32], strides = [1, 1]} : vector<8x128xf32> to vector<8x32xf32>
    %115 = arith.negf %114 : vector<8x32xf32>
    %116 = math.exp %115 : vector<8x32xf32>
    %cst_39 = arith.constant 1.000000e+00 : f32
    %117 = vector.broadcast %cst_39 : f32 to vector<8x32xf32>
    %118 = arith.addf %117, %116 : vector<8x32xf32>
    %119 = arith.divf %117, %118 : vector<8x32xf32>
    %120 = vector.extract_strided_slice %113 {offsets = [0, 32], sizes = [8, 32], strides = [1, 1]} : vector<8x128xf32> to vector<8x32xf32>
    %121 = arith.negf %120 : vector<8x32xf32>
    %122 = math.exp %121 : vector<8x32xf32>
    %cst_40 = arith.constant 1.000000e+00 : f32
    %123 = vector.broadcast %cst_40 : f32 to vector<8x32xf32>
    %124 = arith.addf %123, %122 : vector<8x32xf32>
    %125 = arith.divf %123, %124 : vector<8x32xf32>
    %126 = vector.extract_strided_slice %113 {offsets = [0, 64], sizes = [8, 32], strides = [1, 1]} : vector<8x128xf32> to vector<8x32xf32>
    %127 = math.tanh %126 : vector<8x32xf32>
    %128 = vector.extract_strided_slice %113 {offsets = [0, 96], sizes = [8, 32], strides = [1, 1]} : vector<8x128xf32> to vector<8x32xf32>
    %129 = arith.negf %128 : vector<8x32xf32>
    %130 = math.exp %129 : vector<8x32xf32>
    %cst_41 = arith.constant 1.000000e+00 : f32
    %131 = vector.broadcast %cst_41 : f32 to vector<8x32xf32>
    %132 = arith.addf %131, %130 : vector<8x32xf32>
    %133 = arith.divf %131, %132 : vector<8x32xf32>
    %134 = arith.mulf %125, %106 : vector<8x32xf32>
    %135 = arith.mulf %119, %127 : vector<8x32xf32>
    %136 = arith.addf %134, %135 : vector<8x32xf32>
    %137 = math.tanh %136 : vector<8x32xf32>
    %138 = arith.mulf %133, %137 : vector<8x32xf32>
    %c2_i32 = arith.constant 2 : i32
    %139 = vector.broadcast %c2_i32 : i32 to vector<8x1xi32>
    %140 = arith.cmpi sgt, %0, %139 : vector<8x1xi32>
    %141 = vector.shape_cast %140 : vector<8x1xi1> to vector<8x1xi1>
    %142 = vector.broadcast %141 : vector<8x1xi1> to vector<8x32xi1>
    %143 = arith.select %142, %138, %103 : vector<8x32xi1>, vector<8x32xf32>
    %144 = vector.shape_cast %140 : vector<8x1xi1> to vector<8x1xi1>
    %145 = vector.broadcast %144 : vector<8x1xi1> to vector<8x32xi1>
    %146 = arith.select %145, %136, %106 : vector<8x32xi1>, vector<8x32xf32>
    %cst_42 = arith.constant 0.000000e+00 : f32
    %147 = vector.broadcast %cst_42 : f32 to vector<8x32xf32>
    %148 = vector.shape_cast %140 : vector<8x1xi1> to vector<8x1xi1>
    %149 = vector.broadcast %148 : vector<8x1xi1> to vector<8x32xi1>
    %150 = arith.select %149, %138, %147 : vector<8x32xi1>, vector<8x32xf32>
    %151 = vector.extract_strided_slice %27 {offsets = [24, 0], sizes = [8, 128], strides = [1, 1]} : vector<64x128xf32> to vector<8x128xf32>
    %cst_43 = arith.constant dense<0.000000e+00> : vector<8x128xf32>
    %152 = tpu.matmul %143, %28, %cst_43 {dimension_numbers = #tpu.dot_dimension_numbers<[1], [0], [0], [1], [0, 0, 1, 1], [], []>} : vector<8x32xf32>, vector<32x128xf32>, vector<8x128xf32> -> vector<8x128xf32>
    %153 = arith.addf %151, %152 : vector<8x128xf32>
    %154 = vector.extract_strided_slice %153 {offsets = [0, 0], sizes = [8, 32], strides = [1, 1]} : vector<8x128xf32> to vector<8x32xf32>
    %155 = arith.negf %154 : vector<8x32xf32>
    %156 = math.exp %155 : vector<8x32xf32>
    %cst_44 = arith.constant 1.000000e+00 : f32
    %157 = vector.broadcast %cst_44 : f32 to vector<8x32xf32>
    %158 = arith.addf %157, %156 : vector<8x32xf32>
    %159 = arith.divf %157, %158 : vector<8x32xf32>
    %160 = vector.extract_strided_slice %153 {offsets = [0, 32], sizes = [8, 32], strides = [1, 1]} : vector<8x128xf32> to vector<8x32xf32>
    %161 = arith.negf %160 : vector<8x32xf32>
    %162 = math.exp %161 : vector<8x32xf32>
    %cst_45 = arith.constant 1.000000e+00 : f32
    %163 = vector.broadcast %cst_45 : f32 to vector<8x32xf32>
    %164 = arith.addf %163, %162 : vector<8x32xf32>
    %165 = arith.divf %163, %164 : vector<8x32xf32>
    %166 = vector.extract_strided_slice %153 {offsets = [0, 64], sizes = [8, 32], strides = [1, 1]} : vector<8x128xf32> to vector<8x32xf32>
    %167 = math.tanh %166 : vector<8x32xf32>
    %168 = vector.extract_strided_slice %153 {offsets = [0, 96], sizes = [8, 32], strides = [1, 1]} : vector<8x128xf32> to vector<8x32xf32>
    %169 = arith.negf %168 : vector<8x32xf32>
    %170 = math.exp %169 : vector<8x32xf32>
    %cst_46 = arith.constant 1.000000e+00 : f32
    %171 = vector.broadcast %cst_46 : f32 to vector<8x32xf32>
    %172 = arith.addf %171, %170 : vector<8x32xf32>
    %173 = arith.divf %171, %172 : vector<8x32xf32>
    %174 = arith.mulf %165, %146 : vector<8x32xf32>
    %175 = arith.mulf %159, %167 : vector<8x32xf32>
    %176 = arith.addf %174, %175 : vector<8x32xf32>
    %177 = math.tanh %176 : vector<8x32xf32>
    %178 = arith.mulf %173, %177 : vector<8x32xf32>
    %c3_i32 = arith.constant 3 : i32
    %179 = vector.broadcast %c3_i32 : i32 to vector<8x1xi32>
    %180 = arith.cmpi sgt, %0, %179 : vector<8x1xi32>
    %181 = vector.shape_cast %180 : vector<8x1xi1> to vector<8x1xi1>
    %182 = vector.broadcast %181 : vector<8x1xi1> to vector<8x32xi1>
    %183 = arith.select %182, %178, %143 : vector<8x32xi1>, vector<8x32xf32>
    %184 = vector.shape_cast %180 : vector<8x1xi1> to vector<8x1xi1>
    %185 = vector.broadcast %184 : vector<8x1xi1> to vector<8x32xi1>
    %186 = arith.select %185, %176, %146 : vector<8x32xi1>, vector<8x32xf32>
    %cst_47 = arith.constant 0.000000e+00 : f32
    %187 = vector.broadcast %cst_47 : f32 to vector<8x32xf32>
    %188 = vector.shape_cast %180 : vector<8x1xi1> to vector<8x1xi1>
    %189 = vector.broadcast %188 : vector<8x1xi1> to vector<8x32xi1>
    %190 = arith.select %189, %178, %187 : vector<8x32xi1>, vector<8x32xf32>
    %191 = vector.extract_strided_slice %27 {offsets = [32, 0], sizes = [8, 128], strides = [1, 1]} : vector<64x128xf32> to vector<8x128xf32>
    %cst_48 = arith.constant dense<0.000000e+00> : vector<8x128xf32>
    %192 = tpu.matmul %183, %28, %cst_48 {dimension_numbers = #tpu.dot_dimension_numbers<[1], [0], [0], [1], [0, 0, 1, 1], [], []>} : vector<8x32xf32>, vector<32x128xf32>, vector<8x128xf32> -> vector<8x128xf32>
    %193 = arith.addf %191, %192 : vector<8x128xf32>
    %194 = vector.extract_strided_slice %193 {offsets = [0, 0], sizes = [8, 32], strides = [1, 1]} : vector<8x128xf32> to vector<8x32xf32>
    %195 = arith.negf %194 : vector<8x32xf32>
    %196 = math.exp %195 : vector<8x32xf32>
    %cst_49 = arith.constant 1.000000e+00 : f32
    %197 = vector.broadcast %cst_49 : f32 to vector<8x32xf32>
    %198 = arith.addf %197, %196 : vector<8x32xf32>
    %199 = arith.divf %197, %198 : vector<8x32xf32>
    %200 = vector.extract_strided_slice %193 {offsets = [0, 32], sizes = [8, 32], strides = [1, 1]} : vector<8x128xf32> to vector<8x32xf32>
    %201 = arith.negf %200 : vector<8x32xf32>
    %202 = math.exp %201 : vector<8x32xf32>
    %cst_50 = arith.constant 1.000000e+00 : f32
    %203 = vector.broadcast %cst_50 : f32 to vector<8x32xf32>
    %204 = arith.addf %203, %202 : vector<8x32xf32>
    %205 = arith.divf %203, %204 : vector<8x32xf32>
    %206 = vector.extract_strided_slice %193 {offsets = [0, 64], sizes = [8, 32], strides = [1, 1]} : vector<8x128xf32> to vector<8x32xf32>
    %207 = math.tanh %206 : vector<8x32xf32>
    %208 = vector.extract_strided_slice %193 {offsets = [0, 96], sizes = [8, 32], strides = [1, 1]} : vector<8x128xf32> to vector<8x32xf32>
    %209 = arith.negf %208 : vector<8x32xf32>
    %210 = math.exp %209 : vector<8x32xf32>
    %cst_51 = arith.constant 1.000000e+00 : f32
    %211 = vector.broadcast %cst_51 : f32 to vector<8x32xf32>
    %212 = arith.addf %211, %210 : vector<8x32xf32>
    %213 = arith.divf %211, %212 : vector<8x32xf32>
    %214 = arith.mulf %205, %186 : vector<8x32xf32>
    %215 = arith.mulf %199, %207 : vector<8x32xf32>
    %216 = arith.addf %214, %215 : vector<8x32xf32>
    %217 = math.tanh %216 : vector<8x32xf32>
    %218 = arith.mulf %213, %217 : vector<8x32xf32>
    %c4_i32 = arith.constant 4 : i32
    %219 = vector.broadcast %c4_i32 : i32 to vector<8x1xi32>
    %220 = arith.cmpi sgt, %0, %219 : vector<8x1xi32>
    %221 = vector.shape_cast %220 : vector<8x1xi1> to vector<8x1xi1>
    %222 = vector.broadcast %221 : vector<8x1xi1> to vector<8x32xi1>
    %223 = arith.select %222, %218, %183 : vector<8x32xi1>, vector<8x32xf32>
    %224 = vector.shape_cast %220 : vector<8x1xi1> to vector<8x1xi1>
    %225 = vector.broadcast %224 : vector<8x1xi1> to vector<8x32xi1>
    %226 = arith.select %225, %216, %186 : vector<8x32xi1>, vector<8x32xf32>
    %cst_52 = arith.constant 0.000000e+00 : f32
    %227 = vector.broadcast %cst_52 : f32 to vector<8x32xf32>
    %228 = vector.shape_cast %220 : vector<8x1xi1> to vector<8x1xi1>
    %229 = vector.broadcast %228 : vector<8x1xi1> to vector<8x32xi1>
    %230 = arith.select %229, %218, %227 : vector<8x32xi1>, vector<8x32xf32>
    %231 = vector.extract_strided_slice %27 {offsets = [40, 0], sizes = [8, 128], strides = [1, 1]} : vector<64x128xf32> to vector<8x128xf32>
    %cst_53 = arith.constant dense<0.000000e+00> : vector<8x128xf32>
    %232 = tpu.matmul %223, %28, %cst_53 {dimension_numbers = #tpu.dot_dimension_numbers<[1], [0], [0], [1], [0, 0, 1, 1], [], []>} : vector<8x32xf32>, vector<32x128xf32>, vector<8x128xf32> -> vector<8x128xf32>
    %233 = arith.addf %231, %232 : vector<8x128xf32>
    %234 = vector.extract_strided_slice %233 {offsets = [0, 0], sizes = [8, 32], strides = [1, 1]} : vector<8x128xf32> to vector<8x32xf32>
    %235 = arith.negf %234 : vector<8x32xf32>
    %236 = math.exp %235 : vector<8x32xf32>
    %cst_54 = arith.constant 1.000000e+00 : f32
    %237 = vector.broadcast %cst_54 : f32 to vector<8x32xf32>
    %238 = arith.addf %237, %236 : vector<8x32xf32>
    %239 = arith.divf %237, %238 : vector<8x32xf32>
    %240 = vector.extract_strided_slice %233 {offsets = [0, 32], sizes = [8, 32], strides = [1, 1]} : vector<8x128xf32> to vector<8x32xf32>
    %241 = arith.negf %240 : vector<8x32xf32>
    %242 = math.exp %241 : vector<8x32xf32>
    %cst_55 = arith.constant 1.000000e+00 : f32
    %243 = vector.broadcast %cst_55 : f32 to vector<8x32xf32>
    %244 = arith.addf %243, %242 : vector<8x32xf32>
    %245 = arith.divf %243, %244 : vector<8x32xf32>
    %246 = vector.extract_strided_slice %233 {offsets = [0, 64], sizes = [8, 32], strides = [1, 1]} : vector<8x128xf32> to vector<8x32xf32>
    %247 = math.tanh %246 : vector<8x32xf32>
    %248 = vector.extract_strided_slice %233 {offsets = [0, 96], sizes = [8, 32], strides = [1, 1]} : vector<8x128xf32> to vector<8x32xf32>
    %249 = arith.negf %248 : vector<8x32xf32>
    %250 = math.exp %249 : vector<8x32xf32>
    %cst_56 = arith.constant 1.000000e+00 : f32
    %251 = vector.broadcast %cst_56 : f32 to vector<8x32xf32>
    %252 = arith.addf %251, %250 : vector<8x32xf32>
    %253 = arith.divf %251, %252 : vector<8x32xf32>
    %254 = arith.mulf %245, %226 : vector<8x32xf32>
    %255 = arith.mulf %239, %247 : vector<8x32xf32>
    %256 = arith.addf %254, %255 : vector<8x32xf32>
    %257 = math.tanh %256 : vector<8x32xf32>
    %258 = arith.mulf %253, %257 : vector<8x32xf32>
    %c5_i32 = arith.constant 5 : i32
    %259 = vector.broadcast %c5_i32 : i32 to vector<8x1xi32>
    %260 = arith.cmpi sgt, %0, %259 : vector<8x1xi32>
    %261 = vector.shape_cast %260 : vector<8x1xi1> to vector<8x1xi1>
    %262 = vector.broadcast %261 : vector<8x1xi1> to vector<8x32xi1>
    %263 = arith.select %262, %258, %223 : vector<8x32xi1>, vector<8x32xf32>
    %264 = vector.shape_cast %260 : vector<8x1xi1> to vector<8x1xi1>
    %265 = vector.broadcast %264 : vector<8x1xi1> to vector<8x32xi1>
    %266 = arith.select %265, %256, %226 : vector<8x32xi1>, vector<8x32xf32>
    %cst_57 = arith.constant 0.000000e+00 : f32
    %267 = vector.broadcast %cst_57 : f32 to vector<8x32xf32>
    %268 = vector.shape_cast %260 : vector<8x1xi1> to vector<8x1xi1>
    %269 = vector.broadcast %268 : vector<8x1xi1> to vector<8x32xi1>
    %270 = arith.select %269, %258, %267 : vector<8x32xi1>, vector<8x32xf32>
    %271 = vector.extract_strided_slice %27 {offsets = [48, 0], sizes = [8, 128], strides = [1, 1]} : vector<64x128xf32> to vector<8x128xf32>
    %cst_58 = arith.constant dense<0.000000e+00> : vector<8x128xf32>
    %272 = tpu.matmul %263, %28, %cst_58 {dimension_numbers = #tpu.dot_dimension_numbers<[1], [0], [0], [1], [0, 0, 1, 1], [], []>} : vector<8x32xf32>, vector<32x128xf32>, vector<8x128xf32> -> vector<8x128xf32>
    %273 = arith.addf %271, %272 : vector<8x128xf32>
    %274 = vector.extract_strided_slice %273 {offsets = [0, 0], sizes = [8, 32], strides = [1, 1]} : vector<8x128xf32> to vector<8x32xf32>
    %275 = arith.negf %274 : vector<8x32xf32>
    %276 = math.exp %275 : vector<8x32xf32>
    %cst_59 = arith.constant 1.000000e+00 : f32
    %277 = vector.broadcast %cst_59 : f32 to vector<8x32xf32>
    %278 = arith.addf %277, %276 : vector<8x32xf32>
    %279 = arith.divf %277, %278 : vector<8x32xf32>
    %280 = vector.extract_strided_slice %273 {offsets = [0, 32], sizes = [8, 32], strides = [1, 1]} : vector<8x128xf32> to vector<8x32xf32>
    %281 = arith.negf %280 : vector<8x32xf32>
    %282 = math.exp %281 : vector<8x32xf32>
    %cst_60 = arith.constant 1.000000e+00 : f32
    %283 = vector.broadcast %cst_60 : f32 to vector<8x32xf32>
    %284 = arith.addf %283, %282 : vector<8x32xf32>
    %285 = arith.divf %283, %284 : vector<8x32xf32>
    %286 = vector.extract_strided_slice %273 {offsets = [0, 64], sizes = [8, 32], strides = [1, 1]} : vector<8x128xf32> to vector<8x32xf32>
    %287 = math.tanh %286 : vector<8x32xf32>
    %288 = vector.extract_strided_slice %273 {offsets = [0, 96], sizes = [8, 32], strides = [1, 1]} : vector<8x128xf32> to vector<8x32xf32>
    %289 = arith.negf %288 : vector<8x32xf32>
    %290 = math.exp %289 : vector<8x32xf32>
    %cst_61 = arith.constant 1.000000e+00 : f32
    %291 = vector.broadcast %cst_61 : f32 to vector<8x32xf32>
    %292 = arith.addf %291, %290 : vector<8x32xf32>
    %293 = arith.divf %291, %292 : vector<8x32xf32>
    %294 = arith.mulf %285, %266 : vector<8x32xf32>
    %295 = arith.mulf %279, %287 : vector<8x32xf32>
    %296 = arith.addf %294, %295 : vector<8x32xf32>
    %297 = math.tanh %296 : vector<8x32xf32>
    %298 = arith.mulf %293, %297 : vector<8x32xf32>
    %c6_i32 = arith.constant 6 : i32
    %299 = vector.broadcast %c6_i32 : i32 to vector<8x1xi32>
    %300 = arith.cmpi sgt, %0, %299 : vector<8x1xi32>
    %301 = vector.shape_cast %300 : vector<8x1xi1> to vector<8x1xi1>
    %302 = vector.broadcast %301 : vector<8x1xi1> to vector<8x32xi1>
    %303 = arith.select %302, %298, %263 : vector<8x32xi1>, vector<8x32xf32>
    %304 = vector.shape_cast %300 : vector<8x1xi1> to vector<8x1xi1>
    %305 = vector.broadcast %304 : vector<8x1xi1> to vector<8x32xi1>
    %306 = arith.select %305, %296, %266 : vector<8x32xi1>, vector<8x32xf32>
    %cst_62 = arith.constant 0.000000e+00 : f32
    %307 = vector.broadcast %cst_62 : f32 to vector<8x32xf32>
    %308 = vector.shape_cast %300 : vector<8x1xi1> to vector<8x1xi1>
    %309 = vector.broadcast %308 : vector<8x1xi1> to vector<8x32xi1>
    %310 = arith.select %309, %298, %307 : vector<8x32xi1>, vector<8x32xf32>
    %311 = vector.extract_strided_slice %27 {offsets = [56, 0], sizes = [8, 128], strides = [1, 1]} : vector<64x128xf32> to vector<8x128xf32>
    %cst_63 = arith.constant dense<0.000000e+00> : vector<8x128xf32>
    %312 = tpu.matmul %303, %28, %cst_63 {dimension_numbers = #tpu.dot_dimension_numbers<[1], [0], [0], [1], [0, 0, 1, 1], [], []>} : vector<8x32xf32>, vector<32x128xf32>, vector<8x128xf32> -> vector<8x128xf32>
    %313 = arith.addf %311, %312 : vector<8x128xf32>
    %314 = vector.extract_strided_slice %313 {offsets = [0, 0], sizes = [8, 32], strides = [1, 1]} : vector<8x128xf32> to vector<8x32xf32>
    %315 = arith.negf %314 : vector<8x32xf32>
    %316 = math.exp %315 : vector<8x32xf32>
    %cst_64 = arith.constant 1.000000e+00 : f32
    %317 = vector.broadcast %cst_64 : f32 to vector<8x32xf32>
    %318 = arith.addf %317, %316 : vector<8x32xf32>
    %319 = arith.divf %317, %318 : vector<8x32xf32>
    %320 = vector.extract_strided_slice %313 {offsets = [0, 32], sizes = [8, 32], strides = [1, 1]} : vector<8x128xf32> to vector<8x32xf32>
    %321 = arith.negf %320 : vector<8x32xf32>
    %322 = math.exp %321 : vector<8x32xf32>
    %cst_65 = arith.constant 1.000000e+00 : f32
    %323 = vector.broadcast %cst_65 : f32 to vector<8x32xf32>
    %324 = arith.addf %323, %322 : vector<8x32xf32>
    %325 = arith.divf %323, %324 : vector<8x32xf32>
    %326 = vector.extract_strided_slice %313 {offsets = [0, 64], sizes = [8, 32], strides = [1, 1]} : vector<8x128xf32> to vector<8x32xf32>
    %327 = math.tanh %326 : vector<8x32xf32>
    %328 = vector.extract_strided_slice %313 {offsets = [0, 96], sizes = [8, 32], strides = [1, 1]} : vector<8x128xf32> to vector<8x32xf32>
    %329 = arith.negf %328 : vector<8x32xf32>
    %330 = math.exp %329 : vector<8x32xf32>
    %cst_66 = arith.constant 1.000000e+00 : f32
    %331 = vector.broadcast %cst_66 : f32 to vector<8x32xf32>
    %332 = arith.addf %331, %330 : vector<8x32xf32>
    %333 = arith.divf %331, %332 : vector<8x32xf32>
    %334 = arith.mulf %325, %306 : vector<8x32xf32>
    %335 = arith.mulf %319, %327 : vector<8x32xf32>
    %336 = arith.addf %334, %335 : vector<8x32xf32>
    %337 = math.tanh %336 : vector<8x32xf32>
    %338 = arith.mulf %333, %337 : vector<8x32xf32>
    %c7_i32 = arith.constant 7 : i32
    %339 = vector.broadcast %c7_i32 : i32 to vector<8x1xi32>
    %340 = arith.cmpi sgt, %0, %339 : vector<8x1xi32>
    %341 = vector.shape_cast %340 : vector<8x1xi1> to vector<8x1xi1>
    %342 = vector.broadcast %341 : vector<8x1xi1> to vector<8x32xi1>
    %343 = arith.select %342, %338, %303 : vector<8x32xi1>, vector<8x32xf32>
    %344 = vector.shape_cast %340 : vector<8x1xi1> to vector<8x1xi1>
    %345 = vector.broadcast %344 : vector<8x1xi1> to vector<8x32xi1>
    %346 = arith.select %345, %336, %306 : vector<8x32xi1>, vector<8x32xf32>
    %cst_67 = arith.constant 0.000000e+00 : f32
    %347 = vector.broadcast %cst_67 : f32 to vector<8x32xf32>
    %348 = vector.shape_cast %340 : vector<8x1xi1> to vector<8x1xi1>
    %349 = vector.broadcast %348 : vector<8x1xi1> to vector<8x32xi1>
    %350 = arith.select %349, %338, %347 : vector<8x32xi1>, vector<8x32xf32>
    %c0_68 = arith.constant 0 : index
    %c0_69 = arith.constant 0 : index
    %c0_70 = arith.constant 0 : index
    %351 = vector.load %arg15[%c0_68, %c0_69, %c0_70] : memref<1x8x32xf32, #tpu.memory_space<vmem>>, vector<1x8x32xf32>
    %352 = vector.shape_cast %351 : vector<1x8x32xf32> to vector<8x32xf32>
    %353 = vector.shape_cast %343 : vector<8x32xf32> to vector<1x8x32xf32>
    tpu.vector_store %arg15[%c0_68, %c0_69, %c0_70], %353 {strides = array<i32>} : memref<1x8x32xf32, #tpu.memory_space<vmem>>, vector<1x8x32xf32>,
    %c0_71 = arith.constant 0 : index
    %c0_72 = arith.constant 0 : index
    %c0_73 = arith.constant 0 : index
    %354 = vector.load %arg16[%c0_71, %c0_72, %c0_73] : memref<1x8x32xf32, #tpu.memory_space<vmem>>, vector<1x8x32xf32>
    %355 = vector.shape_cast %354 : vector<1x8x32xf32> to vector<8x32xf32>
    %356 = vector.shape_cast %346 : vector<8x32xf32> to vector<1x8x32xf32>
    tpu.vector_store %arg16[%c0_71, %c0_72, %c0_73], %356 {strides = array<i32>} : memref<1x8x32xf32, #tpu.memory_space<vmem>>, vector<1x8x32xf32>,
    %357 = tpu.concatenate %70, %110, %150, %190, %230, %270, %310, %350 in 0 : vector<8x32xf32>, vector<8x32xf32>, vector<8x32xf32>, vector<8x32xf32>, vector<8x32xf32>, vector<8x32xf32>, vector<8x32xf32>, vector<8x32xf32> -> vector<64x32xf32>
    %c0_74 = arith.constant 0 : index
    %c0_75 = arith.constant 0 : index
    %358 = vector.load %arg11[%c0_74, %c0_75] : memref<32x128xf32, #tpu.memory_space<vmem>>, vector<32x128xf32>
    %cst_76 = arith.constant dense<0.000000e+00> : vector<64x128xf32>
    %359 = tpu.matmul %357, %358, %cst_76 {dimension_numbers = #tpu.dot_dimension_numbers<[1], [0], [0], [1], [0, 0, 1, 1], [], []>} : vector<64x32xf32>, vector<32x128xf32>, vector<64x128xf32> -> vector<64x128xf32>
    %c0_77 = arith.constant 0 : index
    %c0_78 = arith.constant 0 : index
    %360 = vector.load %arg12[%c0_77, %c0_78] : memref<1x128xf32, #tpu.memory_space<vmem>>, vector<1x128xf32>
    %361 = vector.broadcast %360 : vector<1x128xf32> to vector<64x128xf32>
    %362 = arith.addf %359, %361 : vector<64x128xf32>
    %cst_79 = arith.constant dense<0xFF800000> : vector<64xf32>
    %363 = vector.multi_reduction <maximumf>, %362, %cst_79 [1] : vector<64x128xf32> to vector<64xf32>
    %364 = vector.shape_cast %363 : vector<64xf32> to vector<64x1xf32>
    %365 = vector.broadcast %364 : vector<64x1xf32> to vector<64x128xf32>
    %366 = arith.subf %362, %365 : vector<64x128xf32>
    %367 = math.exp %366 : vector<64x128xf32>
    %c0_80 = arith.constant 0 : index
    %c0_81 = arith.constant 0 : index
    %368 = vector.load %arg13[%c0_80, %c0_81] : memref<128x128xf32, #tpu.memory_space<vmem>>, vector<128x128xf32>
    %cst_82 = arith.constant dense<0.000000e+00> : vector<64x128xf32>
    %369 = tpu.matmul %367, %368, %cst_82 {dimension_numbers = #tpu.dot_dimension_numbers<[1], [0], [0], [1], [0, 0, 1, 1], [], []>} : vector<64x128xf32>, vector<128x128xf32>, vector<64x128xf32> -> vector<64x128xf32>
    %370 = tpu.reciprocal %369 {approx = true} : vector<64x128xf32> -> vector<64x128xf32>
    %371 = arith.mulf %367, %370 : vector<64x128xf32>
    %372 = vector.shape_cast %371 : vector<64x128xf32> to vector<8x8x128xf32>
    %c0_83 = arith.constant 0 : index
    %c0_84 = arith.constant 0 : index
    %c0_85 = arith.constant 0 : index
    %373 = vector.load %arg14[%c0_83, %c0_84, %c0_85] : memref<8x8x128xf32, #tpu.memory_space<vmem>>, vector<8x8x128xf32>
    tpu.vector_store %arg14[%c0_83, %c0_84, %c0_85], %372 {strides = array<i32>} : memref<8x8x128xf32, #tpu.memory_space<vmem>>, vector<8x8x128xf32>,
    return
  }
  func.func @transform_0(%arg0: i32) -> (i32, i32) {
    %c0_i32 = arith.constant 0 : i32
    %c0_i32_0 = arith.constant 0 : i32
    return %arg0, %c0_i32 : i32, i32
  }
  func.func @transform_1(%arg0: i32) -> (i32, i32, i32) {
    %c0_i32 = arith.constant 0 : i32
    %c0_i32_0 = arith.constant 0 : i32
    %c0_i32_1 = arith.constant 0 : i32
    return %c0_i32, %arg0, %c0_i32_0 : i32, i32, i32
  }
  func.func @transform_2(%arg0: i32) -> (i32, i32) {
    %c0_i32 = arith.constant 0 : i32
    %c0_i32_0 = arith.constant 0 : i32
    %c0_i32_1 = arith.constant 0 : i32
    return %c0_i32, %c0_i32_0 : i32, i32
  }
  func.func @transform_3(%arg0: i32) -> (i32, i32) {
    %c0_i32 = arith.constant 0 : i32
    %c0_i32_0 = arith.constant 0 : i32
    %c0_i32_1 = arith.constant 0 : i32
    return %c0_i32, %c0_i32_0 : i32, i32
  }
  func.func @transform_4(%arg0: i32) -> (i32, i32) {
    %c0_i32 = arith.constant 0 : i32
    %c0_i32_0 = arith.constant 0 : i32
    %c0_i32_1 = arith.constant 0 : i32
    return %c0_i32, %c0_i32_0 : i32, i32
  }
  func.func @transform_5(%arg0: i32) -> (i32, i32) {
    %c0_i32 = arith.constant 0 : i32
    %c0_i32_0 = arith.constant 0 : i32
    %c0_i32_1 = arith.constant 0 : i32
    return %c0_i32, %c0_i32_0 : i32, i32
  }
  func.func @transform_6(%arg0: i32) -> (i32, i32) {
    %c0_i32 = arith.constant 0 : i32
    %c0_i32_0 = arith.constant 0 : i32
    %c0_i32_1 = arith.constant 0 : i32
    return %c0_i32, %c0_i32_0 : i32, i32
  }
  func.func @transform_7(%arg0: i32) -> (i32, i32) {
    %c0_i32 = arith.constant 0 : i32
    %c0_i32_0 = arith.constant 0 : i32
    %c0_i32_1 = arith.constant 0 : i32
    return %c0_i32, %c0_i32_0 : i32, i32
  }
  func.func @transform_8(%arg0: i32) -> (i32, i32) {
    %c0_i32 = arith.constant 0 : i32
    %c0_i32_0 = arith.constant 0 : i32
    %c0_i32_1 = arith.constant 0 : i32
    return %c0_i32, %c0_i32_0 : i32, i32
  }
  func.func @transform_9(%arg0: i32) -> (i32, i32) {
    %c0_i32 = arith.constant 0 : i32
    %c0_i32_0 = arith.constant 0 : i32
    %c0_i32_1 = arith.constant 0 : i32
    return %c0_i32, %c0_i32_0 : i32, i32
  }
  func.func @transform_10(%arg0: i32) -> (i32, i32) {
    %c0_i32 = arith.constant 0 : i32
    %c0_i32_0 = arith.constant 0 : i32
    %c0_i32_1 = arith.constant 0 : i32
    return %c0_i32, %c0_i32_0 : i32, i32
  }
  func.func @transform_11(%arg0: i32) -> (i32, i32) {
    %c0_i32 = arith.constant 0 : i32
    %c0_i32_0 = arith.constant 0 : i32
    %c0_i32_1 = arith.constant 0 : i32
    return %c0_i32, %c0_i32_0 : i32, i32
  }
  func.func @transform_12(%arg0: i32) -> (i32, i32) {
    %c0_i32 = arith.constant 0 : i32
    %c0_i32_0 = arith.constant 0 : i32
    %c0_i32_1 = arith.constant 0 : i32
    return %c0_i32, %c0_i32_0 : i32, i32
  }
  func.func @transform_13(%arg0: i32) -> (i32, i32, i32) {
    %c0_i32 = arith.constant 0 : i32
    %c0_i32_0 = arith.constant 0 : i32
    %c0_i32_1 = arith.constant 0 : i32
    return %c0_i32, %arg0, %c0_i32_0 : i32, i32, i32
  }
  func.func @transform_14(%arg0: i32) -> (i32, i32, i32) {
    %c0_i32 = arith.constant 0 : i32
    %c0_i32_0 = arith.constant 0 : i32
    %c0_i32_1 = arith.constant 0 : i32
    return %c0_i32, %arg0, %c0_i32_0 : i32, i32, i32
  }
  func.func @transform_15(%arg0: i32) -> (i32, i32, i32) {
    %c0_i32 = arith.constant 0 : i32
    %c0_i32_0 = arith.constant 0 : i32
    %c0_i32_1 = arith.constant 0 : i32
    return %c0_i32, %arg0, %c0_i32_0 : i32, i32, i32
  }
}

</mosaic_0001>

<bundles_post_ra>
// kernel: forward.1
= control target key start
LH: loop header
LB: loop body
LE: loop exit
PB: predicated region body
PF: predicated region fallthrough
CT: control target
= control target key end

     0   :  { %s2802_s0 = inlined_call_operand.vmem [shape: s32[16,1], index: 0, kind: input, shape index: {}]   ;;  %s2803_s1 = inlined_call_operand.vmem [shape: f32[8,16,8], index: 1, kind: input, shape index: {}]   ;;  %s2804_s2 = inlined_call_operand.vmem [shape: f32[8,32], index: 2, kind: input, shape index: {}]   ;;  %s2805_s3 = inlined_call_operand.vmem [shape: f32[1,32], index: 3, kind: input, shape index: {}]   ;;  %s2806_s4 = inlined_call_operand.vmem [shape: f32[32,32], index: 4, kind: input, shape index: {}]   ;;  %s2807_s5 = inlined_call_operand.vmem [shape: f32[1,32], index: 5, kind: input, shape index: {}]   ;;  %s2808_s6 = inlined_call_operand.vmem [shape: f32[32,128], index: 6, kind: input, shape index: {}]   ;;  %s2809_s7 = inlined_call_operand.vmem [shape: f32[32,128], index: 7, kind: input, shape index: {}]   ;;  %s2810_s8 = inlined_call_operand.vmem [shape: f32[1,128], index: 8, kind: input, shape index: {}]   ;;  %s2811_s9 = inlined_call_operand.vmem [shape: f32[1,128], index: 9, kind: input, shape index: {}]   ;;  %s2812_s10 = inlined_call_operand.vmem [shape: f32[32,128], index: 10, kind: input, shape index: {}]   ;;  %s2813_s11 = inlined_call_operand.vmem [shape: f32[1,128], index: 11, kind: input, shape index: {}]   ;;  %s2814_s12 = inlined_call_operand.vmem [shape: f32[128,128], index: 12, kind: input, shape index: {}]   ;;  %s2815_s13 = inlined_call_operand.vmem [shape: f32[8,16,128], index: 13, kind: output, shape index: {0}]   ;;  %s2816_s14 = inlined_call_operand.hbm [shape: f32[1,16,32], index: 14, kind: output, shape index: {1}]   ;;  %s2817_s15 = inlined_call_operand.hbm [shape: f32[1,16,32], index: 15, kind: output, shape index: {2}]  }
   0x1   :  { %2823 = sst [smem:[#allocation11_spill]] %s2802_s0 }
   0x2   :  { %2824 = sst [smem:[#allocation12_spill]] %s2803_s1 }
   0x3   :  { %2825 = sst [smem:[#allocation13_spill]] %s2804_s2 }
   0x4   :  { %2826 = sst [smem:[#allocation14_spill]] %s2805_s3 }
   0x5   :  { %2827 = sst [smem:[#allocation15_spill]] %s2806_s4 }
   0x6   :  { %2828 = sst [smem:[#allocation16_spill]] %s2807_s5 }
   0x7   :  { %2829 = sst [smem:[#allocation17_spill]] %s2808_s6 }
   0x8   :  { %2830 = sst [smem:[#allocation18_spill]] %s2809_s7 }
   0x9   :  { %2831 = sst [smem:[#allocation19_spill]] %s2810_s8 }
   0xa   :  { %21 = vsyncpa [#allocation5], 0 }
   0xb   :  { %23 = vsyncpa [#allocation5 + $0x1], 0 }
   0xc   :  { %24 = vsyncpa [#allocation7], 0 }
   0xd   :  { %26 = vsyncpa [#allocation7 + $0x1], 0  ;;  %s2281_s18 = smov 0   ;;  %s2283_s19 = smov 0  }
   0xe   :  { %s2285_s20 = smov 0   ;;  %s2287_s21 = smov 0  }
   0xf LB: > { %s2302_s22 = sadd.s32 4294967295, %s2194_s21   ;;  %s1878_s23 = sadd.s32 4294967294, %s2194_s21   ;;  %s2194_s21 = sphi %s2287_s21, %s2853_s21   ;;  %s2190_s20 = sphi %s2285_s20, %s2852_s20   ;;  %s2186_s19 = sphi %s2283_s19, %s2851_s19   ;;  %s2182_s18 = sphi %s2281_s18, %s2850_s18  }
  0x10   : > { %s2306_s24 = sadd.s32 1, %s2194_s21   ;;  %s65_s25 = sadd.s32 1, %s2190_s20 }
  0x11   : > { %s62_s26 = ssub.s32 %s2194_s21, %s2306_s24  ;;  %p72_p0 = scmp.ne.s32.totalorder %s2190_s20, %s2186_s19 }
  0x12   : > { %p63_p1 = scmp.eq.s32.totalorder %s62_s26, 0  ;;  %p73_p2 = scmp.eq.s32.totalorder %s2194_s21, 0 }
  0x13   : > { %p333_p3 = scmp.eq.s32.totalorder %s2302_s22, 1  ;;  %p364_p4 = scmp.ne.s32.totalorder %s2186_s19, %s2182_s18 }
  0x14   : > { %s2318_s27 = scalar_select %p63_p1, %s2190_s20, %s65_s25  }
  0x15   : > { %p74_p5 = por %p73_p2, %p72_p0  ;;  %p2320_p6 = por %p333_p3, %p72_p0 }
  0x16   : > { %2832 = sst [smem:[#allocation10_spill]] %s2318_s27  ;;  %p365_p7 = scmp.eq.s32.totalorder %s1878_s23, 1 }
  0x17   : > { %p1880_p9 = scmp.ge.s32.totalorder %s2194_s21, 2 }
  0x18   : > { %p2324_p8 = por %p365_p7, %p364_p4 }
  0x19   : > { %440 = sbr.rel (%p1880_p9) target bundleno = 48 (0x30), region = 60 }
  0x1e   : > { %450 = sbr.rel (!%p74_p5) target bundleno = 48 (0x30), region = 68  ;;  %s452_s30 = sand.u32 (%p74_p5), 1, %s2190_s20  }
  0x1f   : > { %s1882_s16 = sshll.u32 (%p74_p5), %s2194_s21, 3  ;;  %s1881_s17 = sshll.u32 (%p74_p5), %s452_s30, 6 }
  0x20   : > { %s2835_s1 = sld [smem:[#allocation12_spill]] (%p74_p5)  ;;  %s454_s23 = scalar_lea.vmem (%p74_p5), [#allocation2], %s1881_s17 }
  0x26   : > { %s456_s27 = scalar_lea.vmem %s2835_s1, %s1882_s16 }
  0x27   : > { %v499_v0 = vld [vmem:[%s456_s27] sm:$0xff]  ;;  %v501_v1 = vld [vmem:[%s456_s27 + $0x10] sm:$0xff] }
  0x28   : > { %v503_v2 = vld [vmem:[%s456_s27 + $0x20] sm:$0xff]  ;;  %500 = vst [vmem:[%s454_s23] sm:$0xff] %v499_v0  ;;  %v505_v3 = vld [vmem:[%s456_s27 + $0x30] sm:$0xff] }
  0x29   : > { %502 = vst [vmem:[%s454_s23 + $0x8] sm:$0xff] %v501_v1  ;;  %v507_v4 = vld [vmem:[%s456_s27 + $0x40] sm:$0xff]  ;;  %v509_v5 = vld [vmem:[%s456_s27 + $0x50] sm:$0xff] }
  0x2a   : > { %504 = vst [vmem:[%s454_s23 + $0x10] sm:$0xff] %v503_v2  ;;  %v511_v6 = vld [vmem:[%s456_s27 + $0x60] sm:$0xff]  ;;  %v513_v7 = vld [vmem:[%s456_s27 + $0x70] sm:$0xff] }
  0x2b   : > { %506 = vst [vmem:[%s454_s23 + $0x18] sm:$0xff] %v505_v3 }
  0x2c   : > { %508 = vst [vmem:[%s454_s23 + $0x20] sm:$0xff] %v507_v4 }
  0x2d   : > { %510 = vst [vmem:[%s454_s23 + $0x28] sm:$0xff] %v509_v5 }
  0x2e   : > { %512 = vst [vmem:[%s454_s23 + $0x30] sm:$0xff] %v511_v6 }
  0x2f   : > { %514 = vst [vmem:[%s454_s23 + $0x38] sm:$0xff] %v513_v7 }
  0x30 PF: > { %p1883_p10 = scmp.ge.s32.totalorder %s2194_s21, 1  ;;  %p519_p11 = scmp.lt.s32.totalorder %s2194_s21, 3 }
  0x32   : > { %p520_p12 = pnand %p1883_p10, %p519_p11 }
  0x33   : > { %s2836_s2 = sld [smem:[#allocation13_spill]] (!%p520_p12)  ;;  %s2342_s17 = sand.u32 (!%p520_p12), 1, %s2186_s19  }
  0x34   : > { %523 = sbr.rel (%p520_p12) target bundleno = 5438 (0x153e), region = 106  ;;  %s2818_s27 = sshll.u32 (!%p520_p12), %s2342_s17, 6 }
  0x35   : > { %s528_s25 = scalar_lea.vmem (!%p520_p12), [#allocation2], %s2818_s27  ;;  %s2837_s4 = sld [smem:[#allocation15_spill]] (!%p520_p12) }
  0x36   : > { %s2838_s3 = sld [smem:[#allocation14_spill]] (!%p520_p12)  ;;  %s2821_s23 = smov (!%p520_p12), 64  }
  0x37   : > { %s2839_s6 = sld [smem:[#allocation17_spill]] (!%p520_p12)  ;;  %p586_p13 = scmp.lt.s32.totalorder (!%p520_p12), %s2302_s22, 1 }
  0x38   : > { %s2840_s7 = sld [smem:[#allocation18_spill]] (!%p520_p12)  ;;  %s2846_s1 = sshll.u32 (!%p520_p12), %s2342_s17, 6 }
  0x39   : > { %v607_v8 = vld [vmem:[%s2836_s2] sm:$0xff]  ;;  %vm612_vm0 = vcmask 64512   ;;  %v596_v11 = vld [vmem:[%s528_s25 + $0x28] sm:$0xff]  ;;  %v597_v16 = vld [vmem:[%s528_s25 + $0x30] sm:$0xff]  ;;  %vm694_vm1 = vcmask 261120   ;;  %v2196_v62 = vmov 0.0  }
  0x3a   : > { %652 = vmatpush.msra.mxu0 %v607_v8  ;;  %1944 = vmatpush.msra.mxu3 %v607_v8  ;;  %v591_v9 = vld [vmem:[%s528_s25] sm:$0xff]  ;;  %v592_v12 = vld [vmem:[%s528_s25 + $0x8] sm:$0xff]  ;;  %v604_v13 = vmul.f32 0.1, %v596_v11  ;;  %v605_v17 = vmul.f32 0.1, %v597_v16 }
  0x3b   : > { %v599_v10 = vmul.f32 0.1, %v591_v9  ;;  %v689_v14 = vld [vmem:[%s2837_s4 + $0x18] sm:$0xff]  ;;  %v600_v15 = vmul.f32 0.1, %v592_v12  ;;  %v593_v18 = vld [vmem:[%s528_s25 + $0x10] sm:$0xff] }
  0x3c   : > { %731 = vmatpush.msra.mxu1 %v689_v14  ;;  %1945 = vmatpush.msra.mxu2 %v689_v14  ;;  %v601_v19 = vmul.f32 0.1, %v593_v18  ;;  %v598_v20 = vld [vmem:[%s528_s25 + $0x38] sm:$0xff]  ;;  %v595_v24 = vld [vmem:[%s528_s25 + $0x20] sm:$0xff]  ;;  %v688_v26 = vld [vmem:[%s2837_s4 + $0x10] sm:$0xff]  ;;  %s2841_s5 = sld [smem:[#allocation16_spill]] }
  0x3d   : > { %1889 = vmatmul.msk.f32.vlgmr.msra.gmra.mxu0 %vm612_vm0, %v599_v10  ;;  %1894 = vmatmul.msk.f32.vlgmr.msra.gmra.mxu3 %vm612_vm0, %v604_v13  ;;  %v606_v21 = vmul.f32 0.1, %v598_v20  ;;  %v594_v22 = vld [vmem:[%s528_s25 + $0x18] sm:$0xff]  ;;  %v603_v25 = vmul.f32 0.1, %v595_v24  ;;  %v687_v27 = vld [vmem:[%s2837_s4 + $0x8] sm:$0xff] }
  0x3e   : > { %v602_v23 = vmul.f32 0.1, %v594_v22  ;;  %732 = vmatpush.msra.mxu1 %v688_v26  ;;  %1946 = vmatpush.msra.mxu2 %v688_v26  ;;  %v686_v28 = vld [vmem:[%s2837_s4] sm:$0xff]  ;;  %v774_v33 = vld [vmem:[%s2839_s6 + $0x18] sm:$0xff]  ;;  %v773_v37 = vld [vmem:[%s2839_s6 + $0x10] sm:$0xff]  ;;  %s2842_s8 = sld [smem:[#allocation19_spill]] }
  0x3f   : > { %v2001_v29 = vld [vmem:[%s2838_s3] ss:$0 sm:$0xff]  ;;  %v2381_v38 = vld [vmem:[%s2840_s7 + $0x18] sm:$0xff]  ;;  %v772_v42 = vld [vmem:[%s2839_s6 + $0x8] sm:$0xff]  ;;  %s2819_s25 = smov 32   ;;  %s2843_s0 = sld [smem:[#allocation11_spill]] }
  0x40   : > { %733 = vmatpush.msra.mxu1 %v687_v27  ;;  %1947 = vmatpush.msra.mxu2 %v687_v27  ;;  %v2391_v43 = vld [vmem:[%s2840_s7 + $0x10] sm:$0xff]  ;;  %v2396_v44 = vld [vmem:[%s2840_s7 + $0x8] sm:$0xff]  ;;  %v771_v48 = vld [vmem:[%s2839_s6] sm:$0xff]  ;;  %s587_s30 = scalar_select %p586_p13, %s2302_s22, 1 }
  0x41   : > { %862 = vmatpush.msrb.mxu3 %v2381_v38  ;;  %v2411_v61 = vld [vmem:[%s2840_s7] sm:$0xff]  ;;  %s2844_s3 = smov 32   ;;  %s2677_s27 = scalar_lea.vmem [#allocation3], %s2846_s1 }
  0x42   : > { %734 = vmatpush.msra.mxu1 %v686_v28  ;;  %1948 = vmatpush.msra.mxu2 %v686_v28  ;;  %v2002_v63 = vld [vmem:[%s2841_s5] ss:$0 sm:$0xff]  ;;  %s1888_s16 = sshll.u32 %s587_s30, 3  ;;  %s1939_s30 = sshll.u32 (%p2320_p6), %s2302_s22, 3 }
  0x43   : > { %863 = vmatpush.msrb.mxu3 %v2391_v43  ;;  %s1653_s1 = scalar_lea.vmem (%p2320_p6), %s2815_s13, %s1939_s30 }
  0x44   : > { %814 = vmatpush.msrb.mxu2 %v774_v33  ;;  %v768_v24 = vld [vmem:[%s2842_s8] sm:$0x1] }
  0x45   : > { %1890 = vmatmul.msk.f32.gmra.mxu0 %vm612_vm0, %v600_v15  ;;  %1895 = vmatmul.msk.f32.gmra.mxu3 %vm612_vm0, %v605_v17  ;;  %s589_s2 = scalar_lea.vmem %s2843_s0, %s1888_s16 }
  0x46   : > { %815 = vmatpush.msrb.mxu2 %v773_v37  ;;  %864 = vmatpush.msrb.mxu3 %v2396_v44 }
  0x48   : > { %816 = vmatpush.msrb.mxu2 %v772_v42  ;;  %865 = vmatpush.msrb.mxu3 %v2411_v61 }
  0x4a   : > { %817 = vmatpush.msrb.mxu2 %v771_v48  ;;  %933 = vmatpush.msra.mxu3 %v2381_v38 }
  0x4c   : > { %934 = vmatpush.msra.mxu3 %v2391_v43 }
  0x4d   : > { %1891 = vmatmul.msk.f32.gmra.mxu0 %vm612_vm0, %v601_v19  ;;  %1896 = vmatmul.msk.f32.gmra.mxu3 %vm612_vm0, %v606_v21 }
  0x4e   : > { %935 = vmatpush.msra.mxu3 %v2396_v44 }
  0x50   : > { %936 = vmatpush.msra.mxu3 %v2411_v61 }
  0x55   : > { %1892 = vmatmul.msk.f32.gmra.mxu0 %vm612_vm0, %v602_v23  ;;  %866 = vmatmul.f32.vlgmr.msrb.gmra.mxu3 %v2196_v62  ;;  %v1430_v62 = vld [vmem:[%s2812_s10] sm:$0xff] }
  0x56   : > { %1005 = vmatpush.msrb.mxu3 %v2381_v38 }
  0x58   : > { %1006 = vmatpush.msrb.mxu3 %v2391_v43 }
  0x5a   : > { %1007 = vmatpush.msrb.mxu3 %v2396_v44 }
  0x5c   : > { %1008 = vmatpush.msrb.mxu3 %v2411_v61 }
  0x5d   : > { %1893 = vmatmul.msk.f32.gmra.mxu0 %vm612_vm0, %v603_v25  ;;  %v769_v25 = vld [vmem:[%s2811_s9] sm:$0x1] }
  0x5e   : > { %v770_v26 = vadd.f32 %v769_v25, %v768_v24 }
  0x60   : > { %v2439_v27 = vperm.slane %v770_v26, 0 }
  0xba   : > { %v654_v30 = vpop.f32.mrf.mxu0 }
  0xbb   : > { %v655_v31 = vadd.f32 %v2001_v29, %v654_v30 }
  0xbd   : > { %v678_v32 = vmax.f32 %v655_v31, 0.0 }
  0xbf   : > { %1897 = vmatmul.msk.f32.vlgmr.msra.gmra.mxu1 %vm694_vm1, %v678_v32 }
  0xc0   : > { %v669_v49 = vpop.f32.mrf.mxu3 }
  0xc1   : > { %v670_v53 = vadd.f32 %v2001_v29, %v669_v49 }
  0xc2   : > { %v657_v34 = vpop.f32.mrf.mxu0 }
  0xc3   : > { %v658_v35 = vadd.f32 %v2001_v29, %v657_v34  ;;  %v683_v55 = vmax.f32 %v670_v53, 0.0 }
  0xc5   : > { %v679_v36 = vmax.f32 %v658_v35, 0.0 }
  0xc7   : > { %1898 = vmatmul.msk.f32.gmra.mxu1 %vm694_vm1, %v679_v36 }
  0xc8   : > { %v672_v54 = vpop.f32.mrf.mxu3 }
  0xc9   : > { %v673_v56 = vadd.f32 %v2001_v29, %v672_v54 }
  0xca   : > { %v660_v39 = vpop.f32.mrf.mxu0 }
  0xcb   : > { %v661_v40 = vadd.f32 %v2001_v29, %v660_v39  ;;  %v684_v57 = vmax.f32 %v673_v56, 0.0  ;;  %v2455_v56 = vld [vmem:[%s589_s2] sm:$0xff]  ;;  %s2200_s2 = smov 96  }
  0xcc   : > { %vm908_vm6 = vcmp.gt.s32.totalorder %v2455_v56, 0  ;;  %vm979_vm8 = vcmp.gt.s32.totalorder %v2455_v56, 1  ;;  %vm1051_vm14 = vcmp.gt.s32.totalorder %v2455_v56, 2 }
  0xcd   : > { %v680_v41 = vmax.f32 %v661_v40, 0.0 }
  0xcf   : > { %1899 = vmatmul.msk.f32.gmra.mxu1 %vm694_vm1, %v680_v41 }
  0xd0   : > { %v675_v58 = vpop.f32.mrf.mxu3 }
  0xd1   : > { %v676_v59 = vadd.f32 %v2001_v29, %v675_v58  ;;  %v1433_v58 = vld [vmem:[%s2812_s10 + $0x18] sm:$0xff] }
  0xd2   : > { %v663_v45 = vpop.f32.mrf.mxu0  ;;  %1485 = vmatpush.msrb.mxu0 %v1433_v58 }
  0xd3   : > { %v664_v46 = vadd.f32 %v2001_v29, %v663_v45  ;;  %v685_v60 = vmax.f32 %v676_v59, 0.0  ;;  %v1432_v59 = vld [vmem:[%s2812_s10 + $0x10] sm:$0xff] }
  0xd4   : > { %1486 = vmatpush.msrb.mxu0 %v1432_v59 }
  0xd5   : > { %v681_v47 = vmax.f32 %v664_v46, 0.0 }
  0xd7   : > { %1900 = vmatmul.msk.f32.gmra.mxu1 %vm694_vm1, %v681_v47 }
  0xda   : > { %v666_v50 = vpop.f32.mrf.mxu0 }
  0xdb   : > { %v667_v51 = vadd.f32 %v2001_v29, %v666_v50  ;;  %v867_v29 = vpop.f32.mrf.mxu3 }
  0xdd   : > { %v682_v52 = vmax.f32 %v667_v51, 0.0  ;;  %v2199_v51 = vmov 0  }
  0xde   : > { %1998 = vset.pattern.permute.xlu1 %v2199_v51  ;;  %1999 = vset.pattern.permute.xlu2 %v2199_v51 }
  0xdf   : > { %1901 = vmatmul.msk.f32.vlgmr.msra.gmra.mxu2 %vm694_vm1, %v682_v52  ;;  %2000 = vset.pattern.permute.xlu0 %v2199_v51 }
  0xe7   : > { %1902 = vmatmul.msk.f32.gmra.mxu2 %vm694_vm1, %v683_v55 }
  0xef   : > { %1903 = vmatmul.msk.f32.gmra.mxu2 %vm694_vm1, %v684_v57  ;;  %v909_v57 = vsel %vm908_vm6, 1, %v2199_v51  ;;  %vm1195_vm6 = vcmp.gt.s32.totalorder %v2455_v56, 4 }
  0xf7   : > { %1904 = vmatmul.msk.f32.gmra.mxu2 %vm694_vm1, %v685_v60  ;;  %v1431_v60 = vld [vmem:[%s2812_s10 + $0x8] sm:$0xff] }
  0xf8   : > { %1487 = vmatpush.msrb.mxu0 %v1431_v60 }
  0xfa   : > { %1488 = vmatpush.msrb.mxu0 %v1430_v62 }
 0x13c   : > { %v736_v0 = vpop.f32.mrf.mxu1 }
 0x13d   : > { %v737_v1 = vadd.f32 %v2002_v63, %v736_v0 }
 0x13f   : > { %v760_v2 = vmax.f32 %v737_v1, 0.0 }
 0x141   : > { %1905 = vmatmul.msk.f32.vlgmr.msrb.gmra.mxu2 %vm694_vm1, %v760_v2 }
 0x144   : > { %v739_v3 = vpop.f32.mrf.mxu1 }
 0x145   : > { %v740_v4 = vadd.f32 %v2002_v63, %v739_v3 }
 0x147   : > { %v761_v5 = vmax.f32 %v740_v4, 0.0 }
 0x149   : > { %1906 = vmatmul.msk.f32.gmra.mxu2 %vm694_vm1, %v761_v5 }
 0x14c   : > { %v742_v6 = vpop.f32.mrf.mxu1 }
 0x14d   : > { %v743_v7 = vadd.f32 %v2002_v63, %v742_v6 }
 0x14f   : > { %v762_v8 = vmax.f32 %v743_v7, 0.0 }
 0x151   : > { %1907 = vmatmul.msk.f32.gmra.mxu2 %vm694_vm1, %v762_v8 }
 0x154   : > { %v745_v9 = vpop.f32.mrf.mxu1 }
 0x155   : > { %v746_v10 = vadd.f32 %v2002_v63, %v745_v9 }
 0x157   : > { %v763_v11 = vmax.f32 %v746_v10, 0.0 }
 0x159   : > { %1908 = vmatmul.msk.f32.gmra.mxu2 %vm694_vm1, %v763_v11 }
 0x162   : > { %v748_v12 = vpop.f32.mrf.mxu2 }
 0x163   : > { %v749_v13 = vadd.f32 %v2002_v63, %v748_v12  ;;  %v980_v12 = vsel %vm979_vm8, 1, %v2199_v51 }
 0x165   : > { %v764_v14 = vmax.f32 %v749_v13, 0.0 }
 0x167   : > { %1909 = vmatmul.msk.f32.gmra.mxu2 %vm694_vm1, %v764_v14 }
 0x16a   : > { %v751_v15 = vpop.f32.mrf.mxu2 }
 0x16b   : > { %v752_v16 = vadd.f32 %v2002_v63, %v751_v15 }
 0x16d   : > { %v765_v17 = vmax.f32 %v752_v16, 0.0 }
 0x16f   : > { %1910 = vmatmul.msk.f32.gmra.mxu2 %vm694_vm1, %v765_v17 }
 0x172   : > { %v754_v18 = vpop.f32.mrf.mxu2 }
 0x173   : > { %v755_v19 = vadd.f32 %v2002_v63, %v754_v18 }
 0x175   : > { %v766_v20 = vmax.f32 %v755_v19, 0.0 }
 0x177   : > { %1911 = vmatmul.msk.f32.gmra.mxu2 %vm694_vm1, %v766_v20 }
 0x17a   : > { %v757_v21 = vpop.f32.mrf.mxu2 }
 0x17b   : > { %v758_v22 = vadd.f32 %v2002_v63, %v757_v21 }
 0x17d   : > { %v767_v23 = vmax.f32 %v758_v22, 0.0 }
 0x17f   : > { %1912 = vmatmul.msk.f32.gmra.mxu2 %vm694_vm1, %v767_v23 }
 0x1c4   : > { %v819_v28 = vpop.f32.mrf.mxu2 }
 0x1c5   : > { %v820_v30 = vadd.f32 %v819_v28, %v2439_v27 }
 0x1c7   : > { %v870_v31 = vadd.f32 %v867_v29, %v820_v30 }
 0x1c9   : > { %2004 = vtanh.f32 %v870_v31  ;;  %v1913_v33 = vmul.f32 -1.442695, %v870_v31 }
 0x1cb   : > { %2006 = vpow2.f32 %v1913_v33 }
 0x1cc   : > { %v822_v4 = vpop.f32.mrf.mxu2 }
 0x1cd   : > { %v823_v5 = vadd.f32 %v822_v4, %v2439_v27 }
 0x1cf   : > { %v2005_v32 = vpop.eup %2004 }
 0x1d0   : > { %893 = vrot.lane.b32.xlu0 %v2005_v32, %s2821_s23 }
 0x1d1   : > { %v2007_v34 = vpop.eup %2006 }
 0x1d2   : > { %v874_v35 = vadd.f32 1.0, %v2007_v34 }
 0x1d4   : > { %2008 = vrcp.f32 %v874_v35  ;;  %v886_v42 = vand.u32 2147483648, %v874_v35  ;;  %vm880_vm3 = vweird.f32 %v874_v35  ;;  %v884_v45 = vand.u32 2147483647, %v874_v35 }
 0x1d6   : > { %v887_v47 = vor.u32 1.1754944e-38, %v886_v42  ;;  %vm885_vm5 = vcmp.eq.f32.partialorder %v884_v45, 8.507059e+37  ;;  %v1052_v42 = vsel %vm1051_vm14, 1, %v2199_v51 }
 0x1da   : > { %v2009_v36 = vpop.eup %2008 }
 0x1db   : > { %v876_v37 = vmul.f32 %v2009_v36, %v874_v35  ;;  %vm881_vm2 = vweird.f32 %v2009_v36 }
 0x1dc   : > { %vm882_vm4 = vmor %vm880_vm3, %vm881_vm2 }
 0x1dd   : > { %v877_v39 = vsub.f32 1.0, %v876_v37 }
 0x1df   : > { %v878_v40 = vmul.f32 %v2009_v36, %v877_v39 }
 0x1e1   : > { %v879_v41 = vadd.f32 %v2009_v36, %v878_v40 }
 0x1e3   : > { %v883_v46 = vsel %vm882_vm4, %v2009_v36, %v879_v41  ;;  %v825_v36 = vpop.f32.mrf.mxu2 }
 0x1e4   : > { %v888_v49 = vsel %vm885_vm5, %v887_v47, %v883_v46  ;;  %v826_v37 = vadd.f32 %v825_v36, %v2439_v27  ;;  %vm1123_vm5 = vcmp.gt.s32.totalorder %v2455_v56, 3 }
 0x1e5   : > { %v891_v52 = vmul.f32 0.0, %v888_v49 }
 0x242   : > { %v894_v48 = vpop.permute.xlu0 %893 }
 0x243   : > { %v896_v50 = vmul.f32 %v894_v48, %v888_v49 }
 0x245   : > { %898 = vrot.lane.b32.xlu0 %v896_v50, %s2819_s25 }
 0x2b7   : > { %v899_v53 = vpop.permute.xlu0 %898 }
 0x2b8   : > { %v2449_v54 = vadd.f32 %v899_v53, %v891_v52 }
 0x2ba   : > { %2010 = vtanh.f32 %v2449_v54 }
 0x2c0   : > { %v2011_v55 = vpop.eup %2010 }
 0x2c1   : > { %904 = vrot.lane.b32.xlu1 %v2011_v55, %s2821_s23 }
 0x2c9   : > { %911 = vperm.xlu1 %1998, %v909_v57  }
 0x333   : > { %v905_v63 = vpop.permute.xlu1 %904 }
 0x334   : > { %v907_v0 = vmul.f32 %v905_v63, %v888_v49 }
 0x33b   : > { %v912_v1 = vpop.permute.xlu1 %911 }
 0x33c   : > { %vm913_vm7 = vcmp.eq.s32.totalorder %v912_v1, 1 }
 0x33d   : > { %v914_v2 = vsel %vm913_vm7, %v907_v0, 0.0  ;;  %v915_v25 = vsel %vm913_vm7, %v2449_v54, 0.0 }
 0x33e   : > { %917 = vrot.lane.b32.xlu2 %v914_v2, %s2844_s3 }
 0x398   : > { %v918_v3 = vpop.permute.xlu2 %917 }
 0x399   : > { %1914 = vmatmul.msk.f32.vlgmr.msra.gmra.mxu3 %vm694_vm1, %v918_v3  ;;  %1928 = vmatmul.msk.f32.vlgmr.msrb.gmra.mxu0 %vm694_vm1, %v918_v3 }
 0x39a   : > { %1077 = vmatpush.msra.mxu3 %v2381_v38 }
 0x39c   : > { %1078 = vmatpush.msra.mxu3 %v2391_v43 }
 0x39e   : > { %1079 = vmatpush.msra.mxu3 %v2396_v44 }
 0x3a0   : > { %1080 = vmatpush.msra.mxu3 %v2411_v61 }
 0x41c   : > { %v938_v6 = vpop.f32.mrf.mxu3 }
 0x41d   : > { %v941_v7 = vadd.f32 %v938_v6, %v823_v5 }
 0x41f   : > { %2012 = vtanh.f32 %v941_v7  ;;  %v1915_v9 = vmul.f32 -1.442695, %v941_v7 }
 0x421   : > { %2014 = vpow2.f32 %v1915_v9  ;;  %v828_v9 = vpop.f32.mrf.mxu2 }
 0x425   : > { %v2013_v8 = vpop.eup %2012 }
 0x426   : > { %964 = vrot.lane.b32.xlu2 %v2013_v8, %s2821_s23 }
 0x427   : > { %v2015_v10 = vpop.eup %2014 }
 0x428   : > { %v945_v11 = vadd.f32 1.0, %v2015_v10  ;;  %v829_v10 = vadd.f32 %v828_v9, %v2439_v27 }
 0x42a   : > { %2016 = vrcp.f32 %v945_v11  ;;  %v957_v18 = vand.u32 2147483648, %v945_v11  ;;  %vm951_vm10 = vweird.f32 %v945_v11  ;;  %v955_v19 = vand.u32 2147483647, %v945_v11 }
 0x42c   : > { %v958_v21 = vor.u32 1.1754944e-38, %v957_v18  ;;  %vm956_vm12 = vcmp.eq.f32.partialorder %v955_v19, 8.507059e+37  ;;  %v1196_v18 = vsel %vm1195_vm6, 1, %v2199_v51 }
 0x42e   : > { %982 = vperm.xlu2 %1999, %v980_v12  }
 0x430   : > { %v2017_v13 = vpop.eup %2016 }
 0x431   : > { %v947_v14 = vmul.f32 %v2017_v13, %v945_v11  ;;  %vm952_vm9 = vweird.f32 %v2017_v13 }
 0x432   : > { %vm953_vm11 = vmor %vm951_vm10, %vm952_vm9 }
 0x433   : > { %v948_v15 = vsub.f32 1.0, %v947_v14 }
 0x435   : > { %v949_v16 = vmul.f32 %v2017_v13, %v948_v15 }
 0x437   : > { %v950_v17 = vadd.f32 %v2017_v13, %v949_v16 }
 0x439   : > { %v954_v20 = vsel %vm953_vm11, %v2017_v13, %v950_v17  ;;  %v1124_v17 = vsel %vm1123_vm5, 1, %v2199_v51 }
 0x43a   : > { %v959_v23 = vsel %vm956_vm12, %v958_v21, %v954_v20 }
 0x43b   : > { %v962_v26 = vmul.f32 %v959_v23, %v915_v25 }
 0x480   : > { %v965_v22 = vpop.permute.xlu2 %964 }
 0x481   : > { %v967_v24 = vmul.f32 %v965_v22, %v959_v23 }
 0x483   : > { %969 = vrot.lane.b32.xlu0 %v967_v24, %s2844_s3 }
 0x488   : > { %v2488_v31 = vpop.permute.xlu2 %982 }
 0x489   : > { %vm984_vm13 = vcmp.eq.s32.totalorder %v2488_v31, 1 }
 0x4f5   : > { %v970_v28 = vpop.permute.xlu0 %969 }
 0x4f6   : > { %v972_v29 = vadd.f32 %v970_v28, %v962_v26 }
 0x4f8   : > { %2018 = vtanh.f32 %v972_v29  ;;  %v986_v63 = vsel %vm984_vm13, %v972_v29, %v915_v25 }
 0x4fe   : > { %v2019_v30 = vpop.eup %2018 }
 0x4ff   : > { %975 = vrot.lane.b32.xlu1 %v2019_v30, %s2821_s23 }
 0x571   : > { %v976_v32 = vpop.permute.xlu1 %975 }
 0x572   : > { %v2490_v33 = vmul.f32 %v976_v32, %v959_v23 }
 0x574   : > { %v985_v34 = vsel %vm984_vm13, %v2490_v33, %v914_v2 }
 0x575   : > { %989 = vrot.lane.b32.xlu0 %v985_v34, %s2844_s3 }
 0x5e7   : > { %v990_v35 = vpop.permute.xlu0 %989 }
 0x5e8   : > { %1916 = vmatmul.msk.f32.vlgmr.msrb.gmra.mxu3 %vm694_vm1, %v990_v35 }
 0x5e9   : > { %1149 = vmatpush.msrb.mxu3 %v2381_v38 }
 0x5eb   : > { %1150 = vmatpush.msrb.mxu3 %v2391_v43 }
 0x5ed   : > { %1151 = vmatpush.msrb.mxu3 %v2396_v44 }
 0x5ef   : > { %1152 = vmatpush.msrb.mxu3 %v2411_v61 }
 0x66b   : > { %v1010_v39 = vpop.f32.mrf.mxu3 }
 0x66c   : > { %v1013_v40 = vadd.f32 %v1010_v39, %v826_v37 }
 0x66e   : > { %2020 = vtanh.f32 %v1013_v40  ;;  %v1917_v45 = vmul.f32 -1.442695, %v1013_v40 }
 0x670   : > { %2022 = vpow2.f32 %v1917_v45 }
 0x674   : > { %v2021_v41 = vpop.eup %2020 }
 0x675   : > { %1036 = vrot.lane.b32.xlu1 %v2021_v41, %s2821_s23 }
 0x676   : > { %v2023_v46 = vpop.eup %2022 }
 0x677   : > { %v1017_v47 = vadd.f32 1.0, %v2023_v46 }
 0x679   : > { %2024 = vrcp.f32 %v1017_v47  ;;  %v1029_v54 = vand.u32 2147483648, %v1017_v47  ;;  %vm1023_vm0 = vweird.f32 %v1017_v47  ;;  %v1027_v55 = vand.u32 2147483647, %v1017_v47 }
 0x67b   : > { %v1030_v58 = vor.u32 1.1754944e-38, %v1029_v54  ;;  %vm1028_vm3 = vcmp.eq.f32.partialorder %v1027_v55, 8.507059e+37 }
 0x67d   : > { %1054 = vperm.xlu1 %1998, %v1052_v42  }
 0x67f   : > { %v2025_v48 = vpop.eup %2024 }
 0x680   : > { %v1019_v49 = vmul.f32 %v2025_v48, %v1017_v47  ;;  %vm1024_vm15 = vweird.f32 %v2025_v48  ;;  %v831_v47 = vpop.f32.mrf.mxu2 }
 0x681   : > { %vm1025_vm2 = vmor %vm1023_vm0, %vm1024_vm15 }
 0x682   : > { %v1020_v50 = vsub.f32 1.0, %v1019_v49 }
 0x684   : > { %v1021_v52 = vmul.f32 %v2025_v48, %v1020_v50 }
 0x686   : > { %v1022_v53 = vadd.f32 %v2025_v48, %v1021_v52 }
 0x688   : > { %v1026_v57 = vsel %vm1025_vm2, %v2025_v48, %v1022_v53  ;;  %v832_v48 = vadd.f32 %v831_v47, %v2439_v27 }
 0x689   : > { %v1031_v60 = vsel %vm1028_vm3, %v1030_v58, %v1026_v57  ;;  %vm1267_vm3 = vcmp.gt.s32.totalorder %v2455_v56, 5 }
 0x68a   : > { %v1034_v0 = vmul.f32 %v1031_v60, %v986_v63 }
 0x6e7   : > { %v1037_v59 = vpop.permute.xlu1 %1036 }
 0x6e8   : > { %v1039_v62 = vmul.f32 %v1037_v59, %v1031_v60 }
 0x6ea   : > { %1041 = vrot.lane.b32.xlu2 %v1039_v62, %s2844_s3 }
 0x6ef   : > { %v2510_v4 = vpop.permute.xlu1 %1054 }
 0x6f0   : > { %vm1056_vm4 = vcmp.eq.s32.totalorder %v2510_v4, 1  ;;  %v1568_v4 = vld [vmem:[%s2814_s12 + $0x70] sm:$0xff] }
 0x744   : > { %v1042_v1 = vpop.permute.xlu2 %1041 }
 0x745   : > { %v1044_v2 = vadd.f32 %v1042_v1, %v1034_v0 }
 0x747   : > { %2026 = vtanh.f32 %v1044_v2 }
 0x74d   : > { %v2027_v3 = vpop.eup %2026 }
 0x74e   : > { %1047 = vrot.lane.b32.xlu0 %v2027_v3, %s2821_s23 }
 0x7c0   : > { %v1048_v5 = vpop.permute.xlu0 %1047 }
 0x7c1   : > { %v2512_v6 = vmul.f32 %v1048_v5, %v1031_v60 }
 0x7c3   : > { %v1057_v7 = vsel %vm1056_vm4, %v2512_v6, %v985_v34  ;;  %v1058_v34 = vsel %vm1056_vm4, %v1044_v2, %v986_v63 }
 0x7c4   : > { %1061 = vrot.lane.b32.xlu2 %v1057_v7, %s2844_s3 }
 0x81e   : > { %v1062_v8 = vpop.permute.xlu2 %1061 }
 0x81f   : > { %1918 = vmatmul.msk.f32.vlgmr.msra.gmra.mxu3 %vm694_vm1, %v1062_v8 }
 0x820   : > { %1221 = vmatpush.msra.mxu3 %v2381_v38 }
 0x822   : > { %1222 = vmatpush.msra.mxu3 %v2391_v43 }
 0x824   : > { %1223 = vmatpush.msra.mxu3 %v2396_v44 }
 0x826   : > { %1224 = vmatpush.msra.mxu3 %v2411_v61 }
 0x8a2   : > { %v1082_v11 = vpop.f32.mrf.mxu3 }
 0x8a3   : > { %v1085_v12 = vadd.f32 %v1082_v11, %v829_v10 }
 0x8a5   : > { %2028 = vtanh.f32 %v1085_v12  ;;  %v1919_v14 = vmul.f32 -1.442695, %v1085_v12 }
 0x8a7   : > { %2030 = vpow2.f32 %v1919_v14 }
 0x8ab   : > { %v2029_v13 = vpop.eup %2028 }
 0x8ac   : > { %1108 = vrot.lane.b32.xlu0 %v2029_v13, %s2821_s23 }
 0x8ad   : > { %v2031_v15 = vpop.eup %2030 }
 0x8ae   : > { %v1089_v16 = vadd.f32 1.0, %v2031_v15 }
 0x8b0   : > { %2032 = vrcp.f32 %v1089_v16  ;;  %v1101_v24 = vand.u32 2147483648, %v1089_v16  ;;  %vm1095_vm8 = vweird.f32 %v1089_v16  ;;  %v1099_v25 = vand.u32 2147483647, %v1089_v16 }
 0x8b2   : > { %v1102_v28 = vor.u32 1.1754944e-38, %v1101_v24  ;;  %vm1100_vm10 = vcmp.eq.f32.partialorder %v1099_v25, 8.507059e+37 }
 0x8b4   : > { %1126 = vperm.xlu0 %2000, %v1124_v17  }
 0x8b6   : > { %v2033_v19 = vpop.eup %2032 }
 0x8b7   : > { %v1091_v20 = vmul.f32 %v2033_v19, %v1089_v16  ;;  %vm1096_vm7 = vweird.f32 %v2033_v19 }
 0x8b8   : > { %vm1097_vm9 = vmor %vm1095_vm8, %vm1096_vm7 }
 0x8b9   : > { %v1092_v21 = vsub.f32 1.0, %v1091_v20 }
 0x8bb   : > { %v1093_v22 = vmul.f32 %v2033_v19, %v1092_v21 }
 0x8bc   : > { %1198 = vperm.xlu0 %2000, %v1196_v18   ;;  %v834_v18 = vpop.f32.mrf.mxu2 }
 0x8bd   : > { %v1094_v23 = vadd.f32 %v2033_v19, %v1093_v22 }
 0x8bf   : > { %v1098_v26 = vsel %vm1097_vm9, %v2033_v19, %v1094_v23  ;;  %v835_v19 = vadd.f32 %v834_v18, %v2439_v27  ;;  %v1268_v23 = vsel %vm1267_vm3, 1, %v2199_v51 }
 0x8c0   : > { %v1103_v30 = vsel %vm1100_vm10, %v1102_v28, %v1098_v26  ;;  %vm1339_vm10 = vcmp.gt.s32.totalorder %v2455_v56, 6 }
 0x8c1   : > { %v1106_v35 = vmul.f32 %v1103_v30, %v1058_v34 }
 0x91e   : > { %v1109_v29 = vpop.permute.xlu0 %1108 }
 0x91f   : > { %v1111_v32 = vmul.f32 %v1109_v29, %v1103_v30 }
 0x921   : > { %1113 = vrot.lane.b32.xlu1 %v1111_v32, %s2844_s3 }
 0x926   : > { %v2534_v40 = vpop.permute.xlu0 %1126 }
 0x927   : > { %vm1128_vm11 = vcmp.eq.s32.totalorder %v2534_v40, 1 }
 0x92e   : > { %v2554_v13 = vpop.permute.xlu0 %1198 }
 0x92f   : > { %vm1200_vm2 = vcmp.eq.s32.totalorder %v2554_v13, 1 }
 0x993   : > { %v1114_v36 = vpop.permute.xlu1 %1113 }
 0x994   : > { %v1116_v37 = vadd.f32 %v1114_v36, %v1106_v35 }
 0x996   : > { %2034 = vtanh.f32 %v1116_v37  ;;  %v1130_v8 = vsel %vm1128_vm11, %v1116_v37, %v1058_v34 }
 0x99c   : > { %v2035_v39 = vpop.eup %2034 }
 0x99d   : > { %1119 = vrot.lane.b32.xlu2 %v2035_v39, %s2821_s23 }
 0x9f7   : > { %v1120_v41 = vpop.permute.xlu2 %1119 }
 0x9f8   : > { %v2536_v42 = vmul.f32 %v1120_v41, %v1103_v30 }
 0x9fa   : > { %v1129_v45 = vsel %vm1128_vm11, %v2536_v42, %v1057_v7 }
 0x9fb   : > { %1133 = vrot.lane.b32.xlu1 %v1129_v45, %s2844_s3 }
 0xa6d   : > { %v1134_v46 = vpop.permute.xlu1 %1133 }
 0xa6e   : > { %1920 = vmatmul.msk.f32.vlgmr.msrb.gmra.mxu3 %vm694_vm1, %v1134_v46 }
 0xa6f   : > { %1293 = vmatpush.msrb.mxu3 %v2381_v38 }
 0xa71   : > { %1294 = vmatpush.msrb.mxu3 %v2391_v43 }
 0xa73   : > { %1295 = vmatpush.msrb.mxu3 %v2396_v44 }
 0xa75   : > { %1296 = vmatpush.msrb.mxu3 %v2411_v61 }
 0xaf1   : > { %v1154_v49 = vpop.f32.mrf.mxu3 }
 0xaf2   : > { %v1157_v50 = vadd.f32 %v1154_v49, %v832_v48 }
 0xaf4   : > { %2036 = vtanh.f32 %v1157_v50  ;;  %v1921_v53 = vmul.f32 -1.442695, %v1157_v50 }
 0xaf6   : > { %2038 = vpow2.f32 %v1921_v53 }
 0xafa   : > { %v2037_v52 = vpop.eup %2036 }
 0xafb   : > { %1180 = vrot.lane.b32.xlu2 %v2037_v52, %s2821_s23 }
 0xafc   : > { %v2039_v54 = vpop.eup %2038 }
 0xafd   : > { %v1161_v55 = vadd.f32 1.0, %v2039_v54  ;;  %v837_v54 = vpop.f32.mrf.mxu2 }
 0xaff   : > { %2040 = vrcp.f32 %v1161_v55  ;;  %v1173_v63 = vand.u32 2147483648, %v1161_v55  ;;  %vm1167_vm14 = vweird.f32 %v1161_v55  ;;  %v1171_v0 = vand.u32 2147483647, %v1161_v55 }
 0xb01   : > { %v1174_v2 = vor.u32 1.1754944e-38, %v1173_v63  ;;  %vm1172_vm0 = vcmp.eq.f32.partialorder %v1171_v0, 8.507059e+37 }
 0xb05   : > { %v2041_v57 = vpop.eup %2040 }
 0xb06   : > { %v1163_v58 = vmul.f32 %v2041_v57, %v1161_v55  ;;  %vm1168_vm12 = vweird.f32 %v2041_v57  ;;  %v838_v55 = vadd.f32 %v837_v54, %v2439_v27 }
 0xb07   : > { %vm1169_vm15 = vmor %vm1167_vm14, %vm1168_vm12 }
 0xb08   : > { %v1164_v59 = vsub.f32 1.0, %v1163_v58 }
 0xb0a   : > { %v1165_v60 = vmul.f32 %v2041_v57, %v1164_v59 }
 0xb0c   : > { %v1166_v62 = vadd.f32 %v2041_v57, %v1165_v60  ;;  %v1340_v60 = vsel %vm1339_vm10, 1, %v2199_v51 }
 0xb0e   : > { %v1170_v1 = vsel %vm1169_vm15, %v2041_v57, %v1166_v62 }
 0xb0f   : > { %v1175_v5 = vsel %vm1172_vm0, %v1174_v2, %v1170_v1 }
 0xb10   : > { %v1178_v9 = vmul.f32 %v1175_v5, %v1130_v8 }
 0xb55   : > { %v1181_v3 = vpop.permute.xlu2 %1180 }
 0xb56   : > { %v1183_v7 = vmul.f32 %v1181_v3, %v1175_v5 }
 0xb58   : > { %1185 = vrot.lane.b32.xlu1 %v1183_v7, %s2844_s3 }
 0xbca   : > { %v1186_v10 = vpop.permute.xlu1 %1185 }
 0xbcb   : > { %v1188_v11 = vadd.f32 %v1186_v10, %v1178_v9 }
 0xbcd   : > { %2042 = vtanh.f32 %v1188_v11  ;;  %v1202_v39 = vsel %vm1200_vm2, %v1188_v11, %v1130_v8 }
 0xbd3   : > { %v2043_v12 = vpop.eup %2042 }
 0xbd4   : > { %1191 = vrot.lane.b32.xlu2 %v2043_v12, %s2821_s23 }
 0xc2e   : > { %v1192_v14 = vpop.permute.xlu2 %1191 }
 0xc2f   : > { %v2556_v15 = vmul.f32 %v1192_v14, %v1175_v5 }
 0xc31   : > { %v1201_v16 = vsel %vm1200_vm2, %v2556_v15, %v1129_v45 }
 0xc32   : > { %1205 = vrot.lane.b32.xlu1 %v1201_v16, %s2844_s3 }
 0xca4   : > { %v1206_v17 = vpop.permute.xlu1 %1205 }
 0xca5   : > { %1922 = vmatmul.msk.f32.vlgmr.msra.gmra.mxu3 %vm694_vm1, %v1206_v17 }
 0xca6   : > { %1365 = vmatpush.msra.mxu3 %v2381_v38 }
 0xca8   : > { %1366 = vmatpush.msra.mxu3 %v2391_v43 }
 0xcaa   : > { %1367 = vmatpush.msra.mxu3 %v2396_v44 }
 0xcac   : > { %1368 = vmatpush.msra.mxu3 %v2411_v61 }
 0xd28   : > { %v1226_v20 = vpop.f32.mrf.mxu3 }
 0xd29   : > { %v1229_v21 = vadd.f32 %v1226_v20, %v835_v19 }
 0xd2b   : > { %2044 = vtanh.f32 %v1229_v21  ;;  %v1923_v38 = vmul.f32 -1.442695, %v1229_v21 }
 0xd2d   : > { %2046 = vpow2.f32 %v1923_v38 }
 0xd31   : > { %v2045_v22 = vpop.eup %2044 }
 0xd32   : > { %1252 = vrot.lane.b32.xlu2 %v2045_v22, %s2821_s23 }
 0xd33   : > { %v2047_v43 = vpop.eup %2046 }
 0xd34   : > { %v1233_v44 = vadd.f32 1.0, %v2047_v43 }
 0xd36   : > { %2048 = vrcp.f32 %v1233_v44  ;;  %v1245_v29 = vand.u32 2147483648, %v1233_v44  ;;  %vm1239_vm6 = vweird.f32 %v1233_v44  ;;  %v1243_v30 = vand.u32 2147483647, %v1233_v44 }
 0xd38   : > { %v1246_v34 = vor.u32 1.1754944e-38, %v1245_v29  ;;  %vm1244_vm8 = vcmp.eq.f32.partialorder %v1243_v30, 8.507059e+37  ;;  %v1565_v29 = vld [vmem:[%s2814_s12 + $0x58] sm:$0xff] }
 0xd3a   : > { %1270 = vperm.xlu2 %1999, %v1268_v23  }
 0xd3c   : > { %v2049_v61 = vpop.eup %2048 }
 0xd3d   : > { %v1235_v24 = vmul.f32 %v2049_v61, %v1233_v44  ;;  %vm1240_vm5 = vweird.f32 %v2049_v61  ;;  %v987_v44 = vsel %vm984_vm13, %v2490_v33, 0.0  ;;  %v1569_v33 = vld [vmem:[%s2814_s12 + $0x78] sm:$0xff] }
 0xd3e   : > { %vm1241_vm7 = vmor %vm1239_vm6, %vm1240_vm5  ;;  %1570 = vmatpush.msrb.mxu1 %v1569_v33 }
 0xd3f   : > { %v1236_v25 = vsub.f32 1.0, %v1235_v24 }
 0xd40   : > { %1571 = vmatpush.msrb.mxu1 %v1568_v4 }
 0xd41   : > { %v1237_v26 = vmul.f32 %v2049_v61, %v1236_v25  ;;  %v2617_v25 = vld [vmem:[%s2813_s11] ss:$0 sm:$0xff] }
 0xd43   : > { %v1238_v28 = vadd.f32 %v2049_v61, %v1237_v26  ;;  %v1490_v26 = vpop.f32.mrf.mxu0 }
 0xd44   : > { %v1491_v31 = vadd.f32 %v2617_v25, %v1490_v26 }
 0xd45   : > { %v1242_v32 = vsel %vm1241_vm7, %v2049_v61, %v1238_v28  ;;  %v1059_v61 = vsel %vm1056_vm4, %v2512_v6, 0.0  ;;  %v1567_v6 = vld [vmem:[%s2814_s12 + $0x68] sm:$0xff]  ;;  %v1566_v28 = vld [vmem:[%s2814_s12 + $0x60] sm:$0xff]  ;;  %vm1411_vm7 = vcmp.gt.s32.totalorder %v2455_v56, 7 }
 0xd46   : > { %v1247_v36 = vsel %vm1244_vm8, %v1246_v34, %v1242_v32  ;;  %1572 = vmatpush.msrb.mxu1 %v1567_v6  ;;  %v1564_v32 = vld [vmem:[%s2814_s12 + $0x50] sm:$0xff]  ;;  %v1563_v34 = vld [vmem:[%s2814_s12 + $0x48] sm:$0xff] }
 0xd47   : > { %v1250_v41 = vmul.f32 %v1247_v36, %v1202_v39 }
 0xd48   : > { %1573 = vmatpush.msrb.mxu1 %v1566_v28 }
 0xd4a   : > { %1574 = vmatpush.msrb.mxu1 %v1565_v29 }
 0xd4c   : > { %1575 = vmatpush.msrb.mxu1 %v1564_v32 }
 0xd4e   : > { %1576 = vmatpush.msrb.mxu1 %v1563_v34 }
 0xd8c   : > { %v1253_v35 = vpop.permute.xlu2 %1252 }
 0xd8d   : > { %v1255_v37 = vmul.f32 %v1253_v35, %v1247_v36  ;;  %v1562_v35 = vld [vmem:[%s2814_s12 + $0x40] sm:$0xff] }
 0xd8e   : > { %1577 = vmatpush.msrb.mxu1 %v1562_v35 }
 0xd8f   : > { %1257 = vrot.lane.b32.xlu0 %v1255_v37, %s2844_s3 }
 0xd94   : > { %v1271_v48 = vpop.permute.xlu2 %1270 }
 0xd95   : > { %vm1272_vm9 = vcmp.eq.s32.totalorder %v1271_v48, 1  ;;  %v1556_v48 = vld [vmem:[%s2814_s12 + $0x10] sm:$0xff] }
 0xe01   : > { %v1258_v45 = vpop.permute.xlu0 %1257 }
 0xe02   : > { %v1260_v46 = vadd.f32 %v1258_v45, %v1250_v41  ;;  %v1559_v45 = vld [vmem:[%s2814_s12 + $0x28] sm:$0xff] }
 0xe04   : > { %2050 = vtanh.f32 %v1260_v46  ;;  %v2585_v17 = vsel %vm1272_vm9, %v1260_v46, %v1202_v39  ;;  %v1560_v39 = vld [vmem:[%s2814_s12 + $0x30] sm:$0xff]  ;;  %v1558_v46 = vld [vmem:[%s2814_s12 + $0x20] sm:$0xff] }
 0xe0a   : > { %v2051_v47 = vpop.eup %2050 }
 0xe0b   : > { %1263 = vrot.lane.b32.xlu1 %v2051_v47, %s2821_s23  ;;  %v1557_v47 = vld [vmem:[%s2814_s12 + $0x18] sm:$0xff] }
 0xe7d   : > { %v1264_v49 = vpop.permute.xlu1 %1263 }
 0xe7e   : > { %v1266_v50 = vmul.f32 %v1264_v49, %v1247_v36  ;;  %v1561_v36 = vld [vmem:[%s2814_s12 + $0x38] sm:$0xff]  ;;  %v1555_v49 = vld [vmem:[%s2814_s12 + $0x8] sm:$0xff] }
 0xe7f   : > { %1578 = vmatpush.msrb.mxu1 %v1561_v36 }
 0xe80   : > { %v1273_v52 = vsel %vm1272_vm9, %v1266_v50, %v1201_v16  ;;  %v1275_v24 = vsel %vm1272_vm9, %v1266_v50, 0.0  ;;  %v1554_v50 = vld [vmem:[%s2814_s12] sm:$0xff] }
 0xe81   : > { %1277 = vrot.lane.b32.xlu0 %v1273_v52, %s2844_s3  ;;  %1579 = vmatpush.msrb.mxu1 %v1560_v39 }
 0xe83   : > { %1580 = vmatpush.msrb.mxu1 %v1559_v45 }
 0xe85   : > { %1581 = vmatpush.msrb.mxu1 %v1558_v46 }
 0xe87   : > { %1582 = vmatpush.msrb.mxu1 %v1557_v47 }
 0xe89   : > { %1583 = vmatpush.msrb.mxu1 %v1556_v48 }
 0xe8b   : > { %1584 = vmatpush.msrb.mxu1 %v1555_v49 }
 0xe8d   : > { %1585 = vmatpush.msrb.mxu1 %v1554_v50 }
 0xef3   : > { %v1278_v53 = vpop.permute.xlu0 %1277 }
 0xef4   : > { %1924 = vmatmul.msk.f32.vlgmr.msrb.gmra.mxu3 %vm694_vm1, %v1278_v53 }
 0xf77   : > { %v1298_v57 = vpop.f32.mrf.mxu3 }
 0xf78   : > { %v1301_v58 = vadd.f32 %v1298_v57, %v838_v55 }
 0xf7a   : > { %2052 = vtanh.f32 %v1301_v58  ;;  %v1925_v62 = vmul.f32 -1.442695, %v1301_v58  ;;  %v840_v58 = vpop.f32.mrf.mxu2 }
 0xf7c   : > { %2054 = vpow2.f32 %v1925_v62 }
 0xf80   : > { %v2053_v59 = vpop.eup %2052 }
 0xf81   : > { %1324 = vrot.lane.b32.xlu1 %v2053_v59, %s2821_s23  ;;  %v841_v59 = vadd.f32 %v840_v58, %v2439_v27 }
 0xf82   : > { %v2055_v63 = vpop.eup %2054 }
 0xf83   : > { %v1305_v0 = vadd.f32 1.0, %v2055_v63 }
 0xf85   : > { %2056 = vrcp.f32 %v1305_v0  ;;  %v1317_v8 = vand.u32 2147483648, %v1305_v0  ;;  %vm1311_vm14 = vweird.f32 %v1305_v0  ;;  %v1315_v9 = vand.u32 2147483647, %v1305_v0 }
 0xf87   : > { %v1318_v11 = vor.u32 1.1754944e-38, %v1317_v8  ;;  %vm1316_vm0 = vcmp.eq.f32.partialorder %v1315_v9, 8.507059e+37 }
 0xf89   : > { %1342 = vperm.xlu1 %1998, %v1340_v60  }
 0xf8b   : > { %v2057_v1 = vpop.eup %2056 }
 0xf8c   : > { %v1307_v2 = vmul.f32 %v2057_v1, %v1305_v0  ;;  %vm1312_vm12 = vweird.f32 %v2057_v1 }
 0xf8d   : > { %vm1313_vm15 = vmor %vm1311_vm14, %vm1312_vm12 }
 0xf8e   : > { %v1308_v3 = vsub.f32 1.0, %v1307_v2 }
 0xf90   : > { %v1309_v5 = vmul.f32 %v2057_v1, %v1308_v3 }
 0xf92   : > { %v1310_v7 = vadd.f32 %v2057_v1, %v1309_v5 }
 0xf94   : > { %v1314_v10 = vsel %vm1313_vm15, %v2057_v1, %v1310_v7 }
 0xf95   : > { %v1319_v14 = vsel %vm1316_vm0, %v1318_v11, %v1314_v10 }
 0xf96   : > { %v1322_v18 = vmul.f32 %v1319_v14, %v2585_v17 }
 0xff3   : > { %v1325_v12 = vpop.permute.xlu1 %1324 }
 0xff4   : > { %v1327_v16 = vmul.f32 %v1325_v12, %v1319_v14 }
 0xff6   : > { %1329 = vrot.lane.b32.xlu2 %v1327_v16, %s2844_s3 }
 0xffb   : > { %v2592_v22 = vpop.permute.xlu1 %1342 }
 0xffc   : > { %vm1344_vm3 = vcmp.eq.s32.totalorder %v2592_v22, 1 }
0x1050   : > { %v1330_v19 = vpop.permute.xlu2 %1329 }
0x1051   : > { %v2588_v20 = vadd.f32 %v1330_v19, %v1322_v18 }
0x1053   : > { %2058 = vtanh.f32 %v2588_v20 }
0x1059   : > { %v2059_v21 = vpop.eup %2058 }
0x105a   : > { %1335 = vrot.lane.b32.xlu0 %v2059_v21, %s2821_s23  ;;  %s2845_s23 = smov 64  }
0x10cc   : > { %v1336_v23 = vpop.permute.xlu0 %1335 }
0x10cd   : > { %v2594_v38 = vmul.f32 %v1336_v23, %v1319_v14 }
0x10cf   : > { %v2600_v43 = vsel %vm1344_vm3, %v2594_v38, %v1273_v52  ;;  %v1347_v56 = vsel %vm1344_vm3, %v2594_v38, 0.0 }
0x10d0   : > { %1349 = vrot.lane.b32.xlu2 %v2600_v43, %s2844_s3 }
0x10d8   : > { %1445 = vrot.lane.b32.xlu2 %v987_v44, %s2844_s3  ;;  %v1412_v44 = vsel %vm1411_vm7, 1, %v2199_v51  ;;  %v1131_v51 = vsel %vm1128_vm11, %v2536_v42, 0.0 }
0x10e0   : > { %1447 = vrot.lane.b32.xlu2 %v1059_v61, %s2844_s3  ;;  %v1203_v61 = vsel %vm1200_vm2, %v2556_v15, 0.0 }
0x10e8   : > { %1453 = vrot.lane.b32.xlu2 %v1275_v24, %s2844_s3  ;;  %v1346_v24 = vsel %vm1344_vm3, %v2588_v20, %v2585_v17 }
0x1111   : > { %1514 = vmax.xlane.f32.xlu2 %v1491_v31 }
0x112a   : > { %v1350_v30 = vpop.permute.xlu2 %1349 }
0x112b   : > { %1926 = vmatmul.msk.f32.vlgmr.msra.gmra.mxu3 %vm694_vm1, %v1350_v30 }
0x1132   : > { %v1446_v37 = vpop.permute.xlu2 %1445 }
0x1133   : > { %1929 = vmatmul.msk.f32.gmra.mxu0 %vm694_vm1, %v1446_v37 }
0x113a   : > { %v1448_v41 = vpop.permute.xlu2 %1447 }
0x113b   : > { %1930 = vmatmul.msk.f32.gmra.mxu0 %vm694_vm1, %v1448_v41 }
0x1142   : > { %v2671_v52 = vpop.permute.xlu2 %1453 }
0x1184   : > { %v1515_v53 = vpop.xlane.xlu2 %1514 }
0x1185   : > { %v1530_v54 = vsub.f32 %v1491_v31, %v1515_v53 }
0x1187   : > { %v1538_v55 = vmul.f32 1.442695, %v1530_v54 }
0x1189   : > { %2060 = vpow2.f32 %v1538_v55 }
0x118f   : > { %v2061_v57 = vpop.eup %2060 }
0x1190   : > { %1586 = vmatmul.f32.vlgmr.msrb.gmra.mxu1 %v2061_v57 }
0x11ae   : > { %v1370_v60 = vpop.f32.mrf.mxu3 }
0x11af   : > { %v1373_v62 = vadd.f32 %v1370_v60, %v841_v59 }
0x11b0   : > { %v1493_v13 = vpop.f32.mrf.mxu0 }
0x11b1   : > { %2062 = vtanh.f32 %v1373_v62  ;;  %v1927_v0 = vmul.f32 -1.442695, %v1373_v62  ;;  %v1494_v15 = vadd.f32 %v2617_v25, %v1493_v13 }
0x11b3   : > { %2064 = vpow2.f32 %v1927_v0 }
0x11b7   : > { %v2063_v63 = vpop.eup %2062 }
0x11b8   : > { %1396 = vrot.lane.b32.xlu0 %v2063_v63, %s2845_s23  ;;  %v1496_v38 = vpop.f32.mrf.mxu0 }
0x11b9   : > { %v2065_v1 = vpop.eup %2064  ;;  %v1497_v29 = vadd.f32 %v2617_v25, %v1496_v38 }
0x11ba   : > { %v1377_v2 = vadd.f32 1.0, %v2065_v1 }
0x11bc   : > { %2066 = vrcp.f32 %v1377_v2  ;;  %v1389_v12 = vand.u32 2147483648, %v1377_v2  ;;  %vm1383_vm4 = vweird.f32 %v1377_v2  ;;  %v1387_v14 = vand.u32 2147483647, %v1377_v2 }
0x11be   : > { %v1390_v18 = vor.u32 1.1754944e-38, %v1389_v12  ;;  %vm1388_vm6 = vcmp.eq.f32.partialorder %v1387_v14, 8.507059e+37 }
0x11c2   : > { %v2067_v5 = vpop.eup %2066 }
0x11c3   : > { %v1379_v27 = vmul.f32 %v2067_v5, %v1377_v2  ;;  %vm1384_vm13 = vweird.f32 %v2067_v5 }
0x11c4   : > { %vm1385_vm5 = vmor %vm1383_vm4, %vm1384_vm13 }
0x11c5   : > { %v1380_v9 = vsub.f32 1.0, %v1379_v27 }
0x11c7   : > { %v1381_v10 = vmul.f32 %v2067_v5, %v1380_v9 }
0x11c9   : > { %v1382_v11 = vadd.f32 %v2067_v5, %v1381_v10 }
0x11cb   : > { %v1386_v16 = vsel %vm1385_vm5, %v2067_v5, %v1382_v11 }
0x11cc   : > { %v1391_v21 = vsel %vm1388_vm6, %v1390_v18, %v1386_v16 }
0x11cd   : > { %v1394_v26 = vmul.f32 %v1391_v21, %v1346_v24 }
0x120d   : > { %v1587_v3 = vpop.f32.mrf.mxu1 }
0x120e   : > { %2068 = vrcp.f32 %v1587_v3 }
0x1214   : > { %v2069_v7 = vpop.eup %2068 }
0x1215   : > { %v1619_v8 = vmul.f32 %v2069_v7, %v2061_v57 }
0x1217   : > { %1627 = vst [vmem:[%s2677_s27] sm:$0xff] %v1619_v8 }
0x122a   : > { %v1397_v19 = vpop.permute.xlu0 %1396 }
0x122b   : > { %v1399_v23 = vmul.f32 %v1397_v19, %v1391_v21 }
0x122d   : > { %1401 = vrot.lane.b32.xlu1 %v1399_v23, %s2844_s3 }
0x1235   : > { %1414 = vperm.xlu1 %1998, %v1412_v44  }
0x123d   : > { %1451 = vrot.lane.b32.xlu1 %v1203_v61, %s2844_s3 }
0x129f   : > { %v1402_v31 = vpop.permute.xlu1 %1401 }
0x12a0   : > { %v1404_v33 = vadd.f32 %v1402_v31, %v1394_v26 }
0x12a2   : > { %2070 = vtanh.f32 %v1404_v33 }
0x12a7   : > { %v1415_v17 = vpop.permute.xlu1 %1414 }
0x12a8   : > { %v2071_v4 = vpop.eup %2070  ;;  %vm1416_vm2 = vcmp.eq.s32.totalorder %v1415_v17, 1 }
0x12a9   : > { %1407 = vrot.lane.b32.xlu0 %v2071_v4, %s2845_s23  ;;  %v1418_v57 = vsel %vm1416_vm2, %v1404_v33, %v1346_v24 }
0x12af   : > { %v1452_v42 = vpop.permute.xlu1 %1451 }
0x12b1   : > { %1449 = vrot.lane.b32.xlu0 %v1131_v51, %s2844_s3 }
0x12b9   : > { %1455 = vrot.lane.b32.xlu0 %v1347_v56, %s2844_s3 }
0x12e3   : > { %1516 = vmax.xlane.f32.xlu0 %v1494_v15 }
0x131b   : > { %v1408_v20 = vpop.permute.xlu0 %1407 }
0x131c   : > { %v1410_v6 = vmul.f32 %v1408_v20, %v1391_v21 }
0x131e   : > { %v1419_v28 = vsel %vm1416_vm2, %v1410_v6, 0.0  ;;  %v1417_v55 = vsel %vm1416_vm2, %v1410_v6, %v2600_v43 }
0x131f   : > { %1457 = vrot.lane.b32.xlu1 %v1419_v28, %s2844_s3 }
0x1323   : > { %v1450_v40 = vpop.permute.xlu0 %1449 }
0x1324   : > { %1931 = vmatmul.msk.f32.gmra.mxu0 %vm694_vm1, %v1450_v40 }
0x132b   : > { %v1456_v22 = vpop.permute.xlu0 %1455 }
0x132c   : > { %1932 = vmatmul.msk.f32.gmra.mxu0 %vm694_vm1, %v1452_v42 }
0x1334   : > { %1933 = vmatmul.msk.f32.gmra.mxu0 %vm694_vm1, %v2671_v52 }
0x133c   : > { %1934 = vmatmul.msk.f32.gmra.mxu0 %vm694_vm1, %v1456_v22 }
0x1349   : > { %1518 = vmax.xlane.f32.xlu1 %v1497_v29 }
0x1356   : > { %v1517_v30 = vpop.xlane.xlu0 %1516 }
0x1357   : > { %v1531_v32 = vsub.f32 %v1494_v15, %v1517_v30  ;;  %v1696_v30 = vld [vmem:[%s2677_s27] sm:$0xff] (%p2320_p6) }
0x1358   : > { %1697 = vst [vmem:[%s1653_s1] sm:$0xff] (%p2320_p6), %v1696_v30 }
0x1359   : > { %v1540_v34 = vmul.f32 1.442695, %v1531_v32 }
0x135b   : > { %2072 = vpow2.f32 %v1540_v34 }
0x1361   : > { %v2073_v35 = vpop.eup %2072 }
0x1362   : > { %1589 = vmatmul.f32.gmra.mxu1 %v2073_v35 }
0x1391   : > { %v1458_v36 = vpop.permute.xlu1 %1457 }
0x1392   : > { %1935 = vmatmul.msk.f32.gmra.mxu0 %vm694_vm1, %v1458_v36 }
0x13a1   : > { %v1499_v37 = vpop.f32.mrf.mxu0 }
0x13a2   : > { %v1500_v39 = vadd.f32 %v2617_v25, %v1499_v37 }
0x13a4   : > { %1520 = vmax.xlane.f32.xlu2 %v1500_v39 }
0x13a9   : > { %v1502_v41 = vpop.f32.mrf.mxu0 }
0x13aa   : > { %v1503_v45 = vadd.f32 %v2617_v25, %v1502_v41 }
0x13ac   : > { %1522 = vmax.xlane.f32.xlu2 %v1503_v45 }
0x13b1   : > { %v1505_v46 = vpop.f32.mrf.mxu0 }
0x13b2   : > { %v1506_v47 = vadd.f32 %v2617_v25, %v1505_v46 }
0x13b4   : > { %1524 = vmax.xlane.f32.xlu0 %v1506_v47 }
0x13b9   : > { %v1508_v48 = vpop.f32.mrf.mxu0 }
0x13ba   : > { %v1509_v49 = vadd.f32 %v2617_v25, %v1508_v48 }
0x13bc   : > { %v1519_v50 = vpop.xlane.xlu1 %1518  ;;  %1526 = vmax.xlane.f32.xlu1 %v1509_v49 }
0x13bd   : > { %v1532_v52 = vsub.f32 %v1497_v29, %v1519_v50 }
0x13bf   : > { %v1542_v53 = vmul.f32 1.442695, %v1532_v52 }
0x13c1   : > { %2074 = vpow2.f32 %v1542_v53 }
0x13c7   : > { %v2075_v54 = vpop.eup %2074 }
0x13c8   : > { %1421 = vrot.lane.b32.xlu0 %v1417_v55, %s2844_s3  ;;  %1592 = vmatmul.f32.gmra.mxu1 %v2075_v54  ;;  %s1886_s3 = sshll.u32 %s2342_s17, 3 }
0x13c9   : > { %s2721_s0 = scalar_lea.vmem [#allocation4], %s1886_s3  ;;  %s2725_s4 = scalar_lea.vmem [#allocation6], %s1886_s3 }
0x13d5   : > { %1426 = vrot.lane.b32.xlu1 %v1418_v57, %s2200_s2 }
0x13df   : > { %v1590_v58 = vpop.f32.mrf.mxu1 }
0x13e0   : > { %2076 = vrcp.f32 %v1590_v58 }
0x13e6   : > { %v2077_v59 = vpop.eup %2076 }
0x13e7   : > { %v1620_v60 = vmul.f32 %v2077_v59, %v2073_v35 }
0x13e9   : > { %1628 = vst [vmem:[%s2677_s27 + $0x8] sm:$0xff] %v1620_v60 }
0x13f0   : > { %v1698_v32 = vld [vmem:[%s2677_s27 + $0x8] sm:$0xff] (%p2320_p6) }
0x13f1   : > { %1699 = vst [vmem:[%s1653_s1 + $0x10] sm:$0xff] (%p2320_p6), %v1698_v32 }
0x140f   : > { %v1511_v62 = vpop.f32.mrf.mxu0 }
0x1410   : > { %v1512_v63 = vadd.f32 %v2617_v25, %v1511_v62 }
0x1412   : > { %1528 = vmax.xlane.f32.xlu2 %v1512_v63 }
0x1417   : > { %v1521_v0 = vpop.xlane.xlu2 %1520 }
0x1418   : > { %v1533_v1 = vsub.f32 %v1500_v39, %v1521_v0 }
0x141a   : > { %v1544_v2 = vmul.f32 1.442695, %v1533_v1 }
0x141c   : > { %2078 = vpow2.f32 %v1544_v2 }
0x141f   : > { %v1523_v43 = vpop.xlane.xlu2 %1522 }
0x1420   : > { %v1534_v3 = vsub.f32 %v1503_v45, %v1523_v43 }
0x1422   : > { %v2079_v5 = vpop.eup %2078  ;;  %v1546_v7 = vmul.f32 1.442695, %v1534_v3 }
0x1423   : > { %1595 = vmatmul.f32.gmra.mxu1 %v2079_v5 }
0x1424   : > { %2080 = vpow2.f32 %v1546_v7 }
0x1427   : > { %v1525_v8 = vpop.xlane.xlu0 %1524 }
0x1428   : > { %v1535_v27 = vsub.f32 %v1506_v47, %v1525_v8 }
0x142a   : > { %v2081_v9 = vpop.eup %2080  ;;  %v1548_v10 = vmul.f32 1.442695, %v1535_v27 }
0x142b   : > { %1598 = vmatmul.f32.gmra.mxu1 %v2081_v9 }
0x142c   : > { %2082 = vpow2.f32 %v1548_v10 }
0x142f   : > { %v1527_v11 = vpop.xlane.xlu1 %1526 }
0x1430   : > { %v1536_v25 = vsub.f32 %v1509_v49, %v1527_v11 }
0x1432   : > { %v2083_v12 = vpop.eup %2082  ;;  %v1550_v14 = vmul.f32 1.442695, %v1536_v25 }
0x1433   : > { %1601 = vmatmul.f32.gmra.mxu1 %v2083_v12 }
0x1434   : > { %2084 = vpow2.f32 %v1550_v14 }
0x143a   : > { %v2085_v16 = vpop.eup %2084  ;;  %v1422_v18 = vpop.permute.xlu0 %1421 }
0x143b   : > { %1424 = vst.msk [vmem:[%s2721_s0] sm:$0xff] %vm694_vm1, %v1422_v18  ;;  %1604 = vmatmul.f32.gmra.mxu1 %v2085_v16 }
0x1445   : > { %v1593_v19 = vpop.f32.mrf.mxu1 }
0x1446   : > { %2086 = vrcp.f32 %v1593_v19 }
0x1447   : > { %v1427_v21 = vpop.permute.xlu1 %1426 }
0x1448   : > { %1429 = vst.msk [vmem:[%s2725_s4] sm:$0xff] %vm694_vm1, %v1427_v21 }
0x144c   : > { %v2087_v23 = vpop.eup %2086 }
0x144d   : > { %v1621_v44 = vmul.f32 %v2087_v23, %v2075_v54 }
0x144f   : > { %1629 = vst [vmem:[%s2677_s27 + $0x10] sm:$0xff] %v1621_v44 }
0x1456   : > { %v1700_v34 = vld [vmem:[%s2677_s27 + $0x10] sm:$0xff] (%p2320_p6) }
0x1457   : > { %1701 = vst [vmem:[%s1653_s1 + $0x20] sm:$0xff] (%p2320_p6), %v1700_v34 }
0x1485   : > { %v1529_v61 = vpop.xlane.xlu2 %1528 }
0x1486   : > { %v1537_v24 = vsub.f32 %v1512_v63, %v1529_v61 }
0x1488   : > { %v1552_v26 = vmul.f32 1.442695, %v1537_v24 }
0x148a   : > { %2088 = vpow2.f32 %v1552_v26 }
0x1490   : > { %v2089_v31 = vpop.eup %2088 }
0x1491   : > { %1607 = vmatmul.f32.gmra.mxu1 %v2089_v31 }
0x14a0   : > { %v1596_v33 = vpop.f32.mrf.mxu1 }
0x14a1   : > { %2090 = vrcp.f32 %v1596_v33 }
0x14a7   : > { %v2091_v4 = vpop.eup %2090 }
0x14a8   : > { %v1622_v51 = vmul.f32 %v2091_v4, %v2079_v5  ;;  %v1599_v56 = vpop.f32.mrf.mxu1 }
0x14a9   : > { %2092 = vrcp.f32 %v1599_v56 }
0x14aa   : > { %1630 = vst [vmem:[%s2677_s27 + $0x18] sm:$0xff] %v1622_v51 }
0x14af   : > { %v2093_v13 = vpop.eup %2092 }
0x14b0   : > { %v1623_v15 = vmul.f32 %v2093_v13, %v2081_v9  ;;  %v1602_v17 = vpop.f32.mrf.mxu1 }
0x14b1   : > { %2094 = vrcp.f32 %v1602_v17  ;;  %v1702_v35 = vld [vmem:[%s2677_s27 + $0x18] sm:$0xff] (%p2320_p6) }
0x14b2   : > { %1631 = vst [vmem:[%s2677_s27 + $0x20] sm:$0xff] %v1623_v15 }
0x14b3   : > { %1703 = vst [vmem:[%s1653_s1 + $0x30] sm:$0xff] (%p2320_p6), %v1702_v35 }
0x14b7   : > { %v2095_v20 = vpop.eup %2094 }
0x14b8   : > { %v1624_v6 = vmul.f32 %v2095_v20, %v2083_v12  ;;  %v1605_v28 = vpop.f32.mrf.mxu1 }
0x14b9   : > { %2096 = vrcp.f32 %v1605_v28  ;;  %v1704_v36 = vld [vmem:[%s2677_s27 + $0x20] sm:$0xff] (%p2320_p6) }
0x14ba   : > { %1632 = vst [vmem:[%s2677_s27 + $0x28] sm:$0xff] %v1624_v6 }
0x14bb   : > { %1705 = vst [vmem:[%s1653_s1 + $0x40] sm:$0xff] (%p2320_p6), %v1704_v36 }
0x14bf   : > { %v2097_v40 = vpop.eup %2096 }
0x14c0   : > { %v1625_v42 = vmul.f32 %v2097_v40, %v2085_v16 }
0x14c1   : > { %v1706_v37 = vld [vmem:[%s2677_s27 + $0x28] sm:$0xff] (%p2320_p6) }
0x14c2   : > { %1633 = vst [vmem:[%s2677_s27 + $0x30] sm:$0xff] %v1625_v42 }
0x14c3   : > { %1707 = vst [vmem:[%s1653_s1 + $0x50] sm:$0xff] (%p2320_p6), %v1706_v37 }
0x14c9   : > { %v1708_v39 = vld [vmem:[%s2677_s27 + $0x30] sm:$0xff] (%p2320_p6) }
0x14ca   : > { %1709 = vst [vmem:[%s1653_s1 + $0x60] sm:$0xff] (%p2320_p6), %v1708_v39 }
0x150e   : > { %v1608_v22 = vpop.f32.mrf.mxu1 }
0x150f   : > { %2098 = vrcp.f32 %v1608_v22 }
0x1514   : > { %1651 = sbr.rel (!%p2320_p6) target bundleno = 5409 (0x1521), region = 114 }
0x1515   : > { %v2099_v38 = vpop.eup %2098 }
0x1516   : > { %v1626_v29 = vmul.f32 %v2099_v38, %v2089_v31 }
0x1518   : > { %1634 = vst [vmem:[%s2677_s27 + $0x38] sm:$0xff] %v1626_v29 }
0x151f   : > { %v1710_v41 = vld [vmem:[%s2677_s27 + $0x38] sm:$0xff] }
0x1520   : > { %1711 = vst [vmem:[%s1653_s1 + $0x70] sm:$0xff] %v1710_v41 }
0x1521 PF: > { %s1940_s2 = sshll.u32 %s2302_s22, 3  ;;  %s1723_s3 = sshll.u32 %s2721_s0, 4  ;;  %s1724_s3 = int_to_ptr.vmem [resolvable:$true] %s1723_s3 }
0x1522   : > { %s1721_s23 = scalar_lea.hbm %s2816_s14, %s1940_s2  ;;  %s1735_s27 = scalar_lea.hbm %s2817_s15, %s1940_s2 }
0x1523   : > { %s1725_s26 = sshll.u32 %s1721_s23, 4  ;;  %s1737_s6 = sshll.u32 %s2725_s4, 4  ;;  %s1726_s26 = int_to_ptr.hbm [resolvable:$true] %s1725_s26  ;;  %s1738_s6 = int_to_ptr.vmem [resolvable:$true] %s1737_s6 }
0x1524   : > { %s2114_s1 = sshra.s32 %s1726_s26, 4  ;;  %s2120_s30 = scalar_lea.hbm %s2816_s14, 16  ;;  %s2115_s1 = int_to_ptr.hbm [resolvable:$true] %s2114_s1 }
0x1525   : > { %s2116_s7 = scalar_lea.hbm %s2115_s1, 8  ;;  %p2121_p3 = scmp.lt.s32.totalorder %s2115_s1, %s2816_s14 }
0x1526   : > { %p2117_p0 = scmp.ne.s32.totalorder %s2115_s1, %s2116_s7  ;;  %p2122_p4 = scmp.lt.s32.totalorder %s2120_s30, %s2116_s7 }
0x1528   : > { %p2118_p1 = pnand %p2117_p0, %p2320_p6  ;;  %p2123_p5 = por %p2122_p4, %p2121_p3 }
0x152a   : > { %p2119_p2 = pneg %p2118_p1 }
0x152c   : > { %p2124_p7 = pnand %p2123_p5, %p2119_p2 }
0x152e   : > { %2127 = shalt.err (!%p2124_p7)
}
0x152f   : > { %s2847_s5 = scalar_lea.sflag [#allocation5], %s2342_s17  ;;  %s1739_s4 = sshll.u32 %s1735_s27, 4  ;;  %s1740_s4 = int_to_ptr.hbm [resolvable:$true] %s1739_s4 }
0x1530   : > { %1949 = dma.vmem_to_hbm [thread:$0]  (%p2320_p6), %s1724_s3, 128, %s1726_s26, %s2847_s5  }
0x1531   : > { %s2142_s25 = sshra.s32 %s1740_s4, 4  ;;  %s2148_s23 = scalar_lea.hbm %s2817_s15, 16  ;;  %s2143_s25 = int_to_ptr.hbm [resolvable:$true] %s2142_s25 }
0x1532   : > { %s2144_s2 = scalar_lea.hbm %s2143_s25, 8  ;;  %p2149_p13 = scmp.lt.s32.totalorder %s2143_s25, %s2817_s15 }
0x1533   : > { %p2145_p10 = scmp.ne.s32.totalorder %s2143_s25, %s2144_s2  ;;  %p2150_p0 = scmp.lt.s32.totalorder %s2148_s23, %s2144_s2 }
0x1535   : > { %p2146_p11 = pnand %p2145_p10, %p2320_p6  ;;  %p2151_p1 = por %p2150_p0, %p2149_p13 }
0x1537   : > { %p2147_p12 = pneg %p2146_p11 }
0x1539   : > { %p2152_p2 = pnand %p2151_p1, %p2147_p12 }
0x153b   : > { %2155 = shalt.err (!%p2152_p2)
}
0x153c   : > { %s2848_s26 = scalar_lea.sflag [#allocation7], %s2342_s17 }
0x153d   : > { %1950 = dma.vmem_to_hbm [thread:$0]  (%p2320_p6), %s1738_s6, 128, %s1740_s4, %s2848_s26  }
0x153e PF: > { %s1758_s3 = sand.u32 1, %s2182_s18   ;;  %p1954_p3 = pnand %p1880_p9, %p2324_p8 }
0x153f   : > { %s1759_s27 = scalar_lea.sflag [#allocation5], %s1758_s3 }
0x1540   : > { %p1955_p4 = pneg %p1954_p3 }
0x1542   : > { %2173 = dma.done.wait (%p1955_p4), %s1759_s27, 128  }
0x1543   : > { %2175 = vsyncadd (%p1955_p4), %s1759_s27, 4294967168  ;;  %s1769_s0 = scalar_lea.sflag [#allocation7], %s1758_s3 }
0x1544   : > { %2177 = dma.done.wait (%p1955_p4), %s1769_s0, 128  }
0x1545   : > { %2179 = vsyncadd (%p1955_p4), %s1769_s0, 4294967168  ;;  %s2849_s28 = sld [smem:[#allocation10_spill]]  ;;  %p29_p6 = scmp.ge.s32.totalorder %s2306_s24, 4  }
0x1546   : > { %s2850_s18 = smov %s2186_s19  ;;  %s2851_s19 = smov %s2190_s20 }
0x1547   : > { %s2853_s21 = smov %s2306_s24  ;;  %31 = sbr.rel (!%p29_p6) target bundleno = 15 (0xf), region = 220 }
0x154b   : > { %s2852_s20 = smov %s2849_s28 }
0x154c   :  { %1775 = vsyncpa [#allocation5], 1 }
0x154d   :  { %1777 = vsyncpa [#allocation5 + $0x1], 1 }
0x154e   :  { %1778 = vsyncpa [#allocation7], 1 }
0x154f   :  { %1780 = vsyncpa [#allocation7 + $0x1], 1 }

</bundles_post_ra>
